<compile_context>
chip_gen: v7x
topology: tpu7x:2x2x1
jax: 0.10.0
libtpu: 0.0.40
codegen_flags: <defaults>
</compile_context>

<pallas_src>
import numpy as np
import jax
import jax.numpy as jnp
from jax.experimental import pallas as pl
from jax.experimental.pallas import tpu as pltpu


def _round_up(v, m):
    return ((v + m - 1) // m) * m


# ------------------------------ fused forward -------------------------------

def conv_encoder_forward(params, x):
    """ConvEncoder forward. x: (N, C, H, W) float32 -> (N, 64*H3*W3) float32."""
    w1, b1 = params["w1"], params["b1"]   # (32, C, 8, 8), (32,)
    w2, b2 = params["w2"], params["b2"]   # (64, 32, 4, 4), (64,)
    w3, b3 = params["w3"], params["b3"]   # (64, 64, 3, 3), (64,)

    N, C, H, W = x.shape
    C1, C2, C3 = w1.shape[0], w2.shape[0], w3.shape[0]

    # conv output sizes (PyTorch floor semantics)
    Ho1, Wo1 = (H - 8) // 4 + 1, (W - 8) // 4 + 1
    Ho2, Wo2 = (Ho1 - 4) // 2 + 1, (Wo1 - 4) // 2 + 1
    Ho3, Wo3 = Ho2 - 2, Wo2 - 2

    # ---- space-to-depth (factor 4) of the input: conv1 -> 2x2 stride-1 conv
    Hc, Wc = 4 * Ho1 + 4, 4 * Wo1 + 4            # cropped size, divisible by 4
    H0, W0 = Hc // 4, Wc // 4                    # = Ho1+1, Wo1+1
    C0 = 16 * C
    xs = x[:, :, :Hc, :Wc].transpose(0, 2, 3, 1)                       # NHWC
    xs = xs.reshape(N, H0, 4, W0, 4, C).transpose(0, 1, 3, 2, 4, 5)
    xs = xs.reshape(N, H0 * W0, C0)              # flat spatial, pitch = W0

    # ---- flat-pitch row budgets (each layer reads contiguous row windows)
    P0 = W0                 # pitch of input / conv1' output / dense-conv2 output
    P2 = Wo2                # pitch of the subsampled conv2 output
    R3 = Ho3 * P2                             # conv3 accumulator rows
    R2p = R3 + (2 * P2 + 2)                   # rows of padded subsampled act2
    R2d = (Ho1 - 3) * P0                      # dense conv2 accumulator rows
    R1 = _round_up(R2d + (3 * P0 + 3), 8)     # conv1' accumulator rows
    R0 = _round_up(R1 + (P0 + 1), 8)          # padded flat input rows

    xs = jnp.pad(xs, ((0, 0), (0, R0 - H0 * W0), (0, 0))).astype(jnp.bfloat16)

    # ---- weight rearrangement (wrapper-side, tiny)
    # conv1: (C1, C, 8, 8) -> (4, 16*C, C1), channel order (u, v, ci) matches s2d
    w1r = w1.reshape(C1, C, 2, 4, 2, 4).transpose(2, 4, 3, 5, 1, 0)
    w1r = w1r.reshape(4, C0, C1).astype(jnp.bfloat16)
    w2r = w2.transpose(2, 3, 1, 0).reshape(16, C1, C2).astype(jnp.bfloat16)
    w3r = w3.transpose(2, 3, 1, 0).reshape(9, C2, C3).astype(jnp.bfloat16)
    b1r = b1.reshape(1, C1).astype(jnp.float32)
    b2r = b2.reshape(1, C2).astype(jnp.float32)
    b3r = b3.reshape(1, C3).astype(jnp.float32)

    # ---- constant 0/1 selection matrix implementing the stride-2 subsample
    sel_np = np.zeros((R2p, R2d), np.float32)
    for h in range(Ho2):
        for w in range(Wo2):
            sel_np[h * P2 + w, (2 * h) * P0 + 2 * w] = 1.0
    sel = jnp.asarray(sel_np, dtype=jnp.bfloat16)

    def kernel(x_ref, w1_ref, b1_ref, w2_ref, b2_ref, w3_ref, b3_ref,
               sel_ref, o_ref):
        xb = x_ref[0]                                          # (R0, C0) bf16

        # conv1': 2x2 stride-1 on the space-to-depth input (pitch P0)
        acc1 = jnp.zeros((R1, C1), jnp.float32)
        for p in range(2):
            for q in range(2):
                off = p * P0 + q
                acc1 = acc1 + jnp.dot(xb[off:off + R1, :], w1_ref[p * 2 + q],
                                      preferred_element_type=jnp.float32)
        a1 = jnp.maximum(acc1 + b1_ref[...], 0.0).astype(jnp.bfloat16)

        # conv2 computed densely (stride 1); stride-2 rows picked afterwards
        acc2 = jnp.zeros((R2d, C2), jnp.float32)
        for di in range(4):
            for dj in range(4):
                off = di * P0 + dj
                acc2 = acc2 + jnp.dot(a1[off:off + R2d, :], w2_ref[di * 4 + dj],
                                      preferred_element_type=jnp.float32)
        h2 = jnp.maximum(acc2 + b2_ref[...], 0.0).astype(jnp.bfloat16)

        # stride-2 subsample via constant 0/1 selection matmul (pitch -> P2)
        a2 = jnp.dot(sel_ref[...], h2,
                     preferred_element_type=jnp.float32).astype(jnp.bfloat16)

        # conv3: 3x3 stride-1 (pitch P2)
        acc3 = jnp.zeros((R3, C3), jnp.float32)
        for di in range(3):
            for dj in range(3):
                off = di * P2 + dj
                acc3 = acc3 + jnp.dot(a2[off:off + R3, :], w3_ref[di * 3 + dj],
                                      preferred_element_type=jnp.float32)
        o_ref[0] = jnp.maximum(acc3 + b3_ref[...], 0.0).astype(o_ref.dtype)

    flops = 2 * N * (4 * R1 * C0 * C1 + 16 * R2d * C1 * C2
                     + R2p * R2d * C2 + 9 * R3 * C2 * C3)
    bytes_accessed = (N * R0 * C0 * 2 + N * R3 * C3 * 4
                      + 2 * (4 * C0 * C1 + 16 * C1 * C2 + 9 * C2 * C3
                             + R2p * R2d)
                      + 4 * (C1 + C2 + C3))

    out = pl.pallas_call(
        kernel,
        out_shape=jax.ShapeDtypeStruct((N, R3, C3), jnp.float32),
        grid_spec=pltpu.PrefetchScalarGridSpec(
            num_scalar_prefetch=0,
            grid=(N,),
            in_specs=[
                pl.BlockSpec((1, R0, C0), lambda n: (n, 0, 0)),   # image (flat)
                pl.BlockSpec((4, C0, C1), lambda n: (0, 0, 0)),   # conv1 weights
                pl.BlockSpec((1, C1), lambda n: (0, 0)),          # bias1
                pl.BlockSpec((16, C1, C2), lambda n: (0, 0, 0)),  # conv2 weights
                pl.BlockSpec((1, C2), lambda n: (0, 0)),          # bias2
                pl.BlockSpec((9, C2, C3), lambda n: (0, 0, 0)),   # conv3 weights
                pl.BlockSpec((1, C3), lambda n: (0, 0)),          # bias3
                pl.BlockSpec((R2p, R2d), lambda n: (0, 0)),       # stride-2 select
            ],
            out_specs=pl.BlockSpec((1, R3, C3), lambda n: (n, 0, 0)),
        ),
        compiler_params=pltpu.CompilerParams(
            dimension_semantics=("parallel",)),
        cost_estimate=pl.CostEstimate(flops=flops, transcendentals=0,
                                      bytes_accessed=bytes_accessed),
    )(xs, w1r, b1r, w2r, b2r, w3r, b3r, sel)

    # keep only valid output pixels and reorder to torch's NCHW Flatten order
    rows = jnp.asarray([h * P2 + w for h in range(Ho3) for w in range(Wo3)],
                       dtype=jnp.int32)
    feat = jnp.take(out, rows, axis=1)                  # (N, Ho3*Wo3, C3)
    feat = feat.transpose(0, 2, 1).reshape(N, C3 * Ho3 * Wo3)
    return feat


# ------------------------- parameter initialization -------------------------

def orthogonal_init(key, shape, gain):
    """Deterministic orthogonal init (same spirit as nn.init.orthogonal_)."""
    rows = shape[0]
    cols = int(np.prod(shape[1:]))
    flat = jax.random.normal(key, (rows, cols), dtype=jnp.float32)
    if rows < cols:
        flat = flat.T
    q, r = jnp.linalg.qr(flat)
    q = q * jnp.sign(jnp.diag(r))
    if rows < cols:
        q = q.T
    return (gain * q).reshape(shape).astype(jnp.float32)


def conv_encoder_params(chan_dim, key):
    gain = float(np.sqrt(2.0))  # nn.init.calculate_gain('relu')
    k1, k2, k3 = jax.random.split(key, 3)
    return {
        "w1": orthogonal_init(k1, (32, chan_dim, 8, 8), gain),
        "b1": jnp.zeros((32,), jnp.float32),
        "w2": orthogonal_init(k2, (64, 32, 4, 4), gain),
        "b2": jnp.zeros((64,), jnp.float32),
        "w3": orthogonal_init(k3, (64, 64, 3, 3), gain),
        "b3": jnp.zeros((64,), jnp.float32),
    }


# ------------------------------ reference check -----------------------------

def ref_forward(params, x):
    def conv(x, w, b, s):
        y = jax.lax.conv_general_dilated(
            x, w, (s, s), "VALID",
            dimension_numbers=("NCHW", "OIHW", "NCHW"))
        return jax.nn.relu(y + b[None, :, None, None])
    h = conv(x, params["w1"], params["b1"], 4)
    h = conv(h, params["w2"], params["b2"], 2)
    h = conv(h, params["w3"], params["b3"], 1)
    return h.reshape(h.shape[0], -1)


if __name__ == "__main__":
    key = jax.random.PRNGKey(0)
    pkey, xkey = jax.random.split(key)

    # smallest Atari-like spatial size the 8/4/3 conv stack supports: 52 -> 12 -> 5 -> 3
    chan_dim, batch, spatial = 4, 2, 52
    params = conv_encoder_params(chan_dim, pkey)
    x = jax.random.normal(xkey, (batch, chan_dim, spatial, spatial), jnp.float32)

    fwd = jax.jit(conv_encoder_forward)
    out = jax.block_until_ready(fwd(params, x))

    ref = jax.block_until_ready(ref_forward(params, x))
    assert out.shape == (batch, 64 * 3 * 3), out.shape
    # bf16 MXU inputs with f32 accumulation -> loosened tolerance vs f32 reference
    np.testing.assert_allclose(np.asarray(out), np.asarray(ref),
                               rtol=5e-2, atol=5e-2)

    print("KERNEL_OK")
</pallas_src>

<mosaic_0001>
module attributes {stable_mosaic.version = 11 : i64} {
  func.func @kernel(%arg0: i32, %arg1: memref<1x176x64xbf16, #tpu.memory_space<vmem>>, %arg2: memref<4x64x32xbf16, #tpu.memory_space<vmem>>, %arg3: memref<1x32xf32, #tpu.memory_space<vmem>>, %arg4: memref<16x32x64xbf16, #tpu.memory_space<vmem>>, %arg5: memref<1x64xf32, #tpu.memory_space<vmem>>, %arg6: memref<9x64x64xbf16, #tpu.memory_space<vmem>>, %arg7: memref<1x64xf32, #tpu.memory_space<vmem>>, %arg8: memref<27x117xbf16, #tpu.memory_space<vmem>>, %arg9: memref<1x15x64xf32, #tpu.memory_space<vmem>>) attributes {dimension_semantics = [#tpu.dimension_semantics<parallel>], iteration_bounds = array<i64: 2>, scalar_prefetch = 0 : i64, scratch_operands = 0 : i64, tpu.core_type = #tpu.core_type<tc>, window_params = [{transform_indices = @transform_0, window_bounds = array<i64: 1, 176, 64>}, {pipeline_mode = #tpu.pipeline_mode<synchronous>, transform_indices = @transform_1, window_bounds = array<i64: 4, 64, 32>}, {pipeline_mode = #tpu.pipeline_mode<synchronous>, transform_indices = @transform_2, window_bounds = array<i64: 1, 32>}, {pipeline_mode = #tpu.pipeline_mode<synchronous>, transform_indices = @transform_3, window_bounds = array<i64: 16, 32, 64>}, {pipeline_mode = #tpu.pipeline_mode<synchronous>, transform_indices = @transform_4, window_bounds = array<i64: 1, 64>}, {pipeline_mode = #tpu.pipeline_mode<synchronous>, transform_indices = @transform_5, window_bounds = array<i64: 9, 64, 64>}, {pipeline_mode = #tpu.pipeline_mode<synchronous>, transform_indices = @transform_6, window_bounds = array<i64: 1, 64>}, {pipeline_mode = #tpu.pipeline_mode<synchronous>, transform_indices = @transform_7, window_bounds = array<i64: 27, 117>}, {transform_indices = @transform_8, window_bounds = array<i64: 1, 15, 64>}]} {
    %c0 = arith.constant 0 : index
    %c0_0 = arith.constant 0 : index
    %c0_1 = arith.constant 0 : index
    %0 = vector.load %arg1[%c0, %c0_0, %c0_1] : memref<1x176x64xbf16, #tpu.memory_space<vmem>>, vector<1x176x64xbf16>
    %1 = vector.shape_cast %0 : vector<1x176x64xbf16> to vector<176x64xbf16>
    %cst = arith.constant 0.000000e+00 : f32
    %2 = vector.broadcast %cst : f32 to vector<160x32xf32>
    %3 = vector.extract_strided_slice %1 {offsets = [0, 0], sizes = [160, 64], strides = [1, 1]} : vector<176x64xbf16> to vector<160x64xbf16>
    %c0_2 = arith.constant 0 : index
    %c0_3 = arith.constant 0 : index
    %c0_4 = arith.constant 0 : index
    %4 = vector.load %arg2[%c0_2, %c0_3, %c0_4] : memref<4x64x32xbf16, #tpu.memory_space<vmem>>, vector<1x64x32xbf16>
    %5 = vector.shape_cast %4 : vector<1x64x32xbf16> to vector<64x32xbf16>
    %cst_5 = arith.constant dense<0.000000e+00> : vector<160x32xf32>
    %6 = tpu.matmul %3, %5, %cst_5 {dimension_numbers = #tpu.dot_dimension_numbers<[1], [0], [0], [1], [0, 0, 1, 1], [], []>} : vector<160x64xbf16>, vector<64x32xbf16>, vector<160x32xf32> -> vector<160x32xf32>
    %7 = arith.addf %2, %6 : vector<160x32xf32>
    %8 = vector.extract_strided_slice %1 {offsets = [1, 0], sizes = [160, 64], strides = [1, 1]} : vector<176x64xbf16> to vector<160x64xbf16>
    %c1 = arith.constant 1 : index
    %c0_6 = arith.constant 0 : index
    %c0_7 = arith.constant 0 : index
    %9 = vector.load %arg2[%c1, %c0_6, %c0_7] : memref<4x64x32xbf16, #tpu.memory_space<vmem>>, vector<1x64x32xbf16>
    %10 = vector.shape_cast %9 : vector<1x64x32xbf16> to vector<64x32xbf16>
    %cst_8 = arith.constant dense<0.000000e+00> : vector<160x32xf32>
    %11 = tpu.matmul %8, %10, %cst_8 {dimension_numbers = #tpu.dot_dimension_numbers<[1], [0], [0], [1], [0, 0, 1, 1], [], []>} : vector<160x64xbf16>, vector<64x32xbf16>, vector<160x32xf32> -> vector<160x32xf32>
    %12 = arith.addf %7, %11 : vector<160x32xf32>
    %13 = vector.extract_strided_slice %1 {offsets = [13, 0], sizes = [160, 64], strides = [1, 1]} : vector<176x64xbf16> to vector<160x64xbf16>
    %c2 = arith.constant 2 : index
    %c0_9 = arith.constant 0 : index
    %c0_10 = arith.constant 0 : index
    %14 = vector.load %arg2[%c2, %c0_9, %c0_10] : memref<4x64x32xbf16, #tpu.memory_space<vmem>>, vector<1x64x32xbf16>
    %15 = vector.shape_cast %14 : vector<1x64x32xbf16> to vector<64x32xbf16>
    %cst_11 = arith.constant dense<0.000000e+00> : vector<160x32xf32>
    %16 = tpu.matmul %13, %15, %cst_11 {dimension_numbers = #tpu.dot_dimension_numbers<[1], [0], [0], [1], [0, 0, 1, 1], [], []>} : vector<160x64xbf16>, vector<64x32xbf16>, vector<160x32xf32> -> vector<160x32xf32>
    %17 = arith.addf %12, %16 : vector<160x32xf32>
    %18 = vector.extract_strided_slice %1 {offsets = [14, 0], sizes = [160, 64], strides = [1, 1]} : vector<176x64xbf16> to vector<160x64xbf16>
    %c3 = arith.constant 3 : index
    %c0_12 = arith.constant 0 : index
    %c0_13 = arith.constant 0 : index
    %19 = vector.load %arg2[%c3, %c0_12, %c0_13] : memref<4x64x32xbf16, #tpu.memory_space<vmem>>, vector<1x64x32xbf16>
    %20 = vector.shape_cast %19 : vector<1x64x32xbf16> to vector<64x32xbf16>
    %cst_14 = arith.constant dense<0.000000e+00> : vector<160x32xf32>
    %21 = tpu.matmul %18, %20, %cst_14 {dimension_numbers = #tpu.dot_dimension_numbers<[1], [0], [0], [1], [0, 0, 1, 1], [], []>} : vector<160x64xbf16>, vector<64x32xbf16>, vector<160x32xf32> -> vector<160x32xf32>
    %22 = arith.addf %17, %21 : vector<160x32xf32>
    %c0_15 = arith.constant 0 : index
    %c0_16 = arith.constant 0 : index
    %23 = vector.load %arg3[%c0_15, %c0_16] : memref<1x32xf32, #tpu.memory_space<vmem>>, vector<1x32xf32>
    %24 = vector.broadcast %23 : vector<1x32xf32> to vector<160x32xf32>
    %25 = arith.addf %22, %24 : vector<160x32xf32>
    %cst_17 = arith.constant 0.000000e+00 : f32
    %26 = vector.broadcast %cst_17 : f32 to vector<160x32xf32>
    %27 = arith.maximumf %25, %26 : vector<160x32xf32>
    %28 = arith.truncf %27 : vector<160x32xf32> to vector<160x32xbf16>
    %cst_18 = arith.constant 0.000000e+00 : f32
    %29 = vector.broadcast %cst_18 : f32 to vector<117x64xf32>
    %30 = vector.extract_strided_slice %28 {offsets = [0, 0], sizes = [117, 32], strides = [1, 1]} : vector<160x32xbf16> to vector<117x32xbf16>
    %c0_19 = arith.constant 0 : index
    %c0_20 = arith.constant 0 : index
    %c0_21 = arith.constant 0 : index
    %31 = vector.load %arg4[%c0_19, %c0_20, %c0_21] : memref<16x32x64xbf16, #tpu.memory_space<vmem>>, vector<1x32x64xbf16>
    %32 = vector.shape_cast %31 : vector<1x32x64xbf16> to vector<32x64xbf16>
    %cst_22 = arith.constant dense<0.000000e+00> : vector<117x64xf32>
    %33 = tpu.matmul %30, %32, %cst_22 {dimension_numbers = #tpu.dot_dimension_numbers<[1], [0], [0], [1], [0, 0, 1, 1], [], []>} : vector<117x32xbf16>, vector<32x64xbf16>, vector<117x64xf32> -> vector<117x64xf32>
    %34 = arith.addf %29, %33 : vector<117x64xf32>
    %35 = vector.extract_strided_slice %28 {offsets = [1, 0], sizes = [117, 32], strides = [1, 1]} : vector<160x32xbf16> to vector<117x32xbf16>
    %c1_23 = arith.constant 1 : index
    %c0_24 = arith.constant 0 : index
    %c0_25 = arith.constant 0 : index
    %36 = vector.load %arg4[%c1_23, %c0_24, %c0_25] : memref<16x32x64xbf16, #tpu.memory_space<vmem>>, vector<1x32x64xbf16>
    %37 = vector.shape_cast %36 : vector<1x32x64xbf16> to vector<32x64xbf16>
    %cst_26 = arith.constant dense<0.000000e+00> : vector<117x64xf32>
    %38 = tpu.matmul %35, %37, %cst_26 {dimension_numbers = #tpu.dot_dimension_numbers<[1], [0], [0], [1], [0, 0, 1, 1], [], []>} : vector<117x32xbf16>, vector<32x64xbf16>, vector<117x64xf32> -> vector<117x64xf32>
    %39 = arith.addf %34, %38 : vector<117x64xf32>
    %40 = vector.extract_strided_slice %28 {offsets = [2, 0], sizes = [117, 32], strides = [1, 1]} : vector<160x32xbf16> to vector<117x32xbf16>
    %c2_27 = arith.constant 2 : index
    %c0_28 = arith.constant 0 : index
    %c0_29 = arith.constant 0 : index
    %41 = vector.load %arg4[%c2_27, %c0_28, %c0_29] : memref<16x32x64xbf16, #tpu.memory_space<vmem>>, vector<1x32x64xbf16>
    %42 = vector.shape_cast %41 : vector<1x32x64xbf16> to vector<32x64xbf16>
    %cst_30 = arith.constant dense<0.000000e+00> : vector<117x64xf32>
    %43 = tpu.matmul %40, %42, %cst_30 {dimension_numbers = #tpu.dot_dimension_numbers<[1], [0], [0], [1], [0, 0, 1, 1], [], []>} : vector<117x32xbf16>, vector<32x64xbf16>, vector<117x64xf32> -> vector<117x64xf32>
    %44 = arith.addf %39, %43 : vector<117x64xf32>
    %45 = vector.extract_strided_slice %28 {offsets = [3, 0], sizes = [117, 32], strides = [1, 1]} : vector<160x32xbf16> to vector<117x32xbf16>
    %c3_31 = arith.constant 3 : index
    %c0_32 = arith.constant 0 : index
    %c0_33 = arith.constant 0 : index
    %46 = vector.load %arg4[%c3_31, %c0_32, %c0_33] : memref<16x32x64xbf16, #tpu.memory_space<vmem>>, vector<1x32x64xbf16>
    %47 = vector.shape_cast %46 : vector<1x32x64xbf16> to vector<32x64xbf16>
    %cst_34 = arith.constant dense<0.000000e+00> : vector<117x64xf32>
    %48 = tpu.matmul %45, %47, %cst_34 {dimension_numbers = #tpu.dot_dimension_numbers<[1], [0], [0], [1], [0, 0, 1, 1], [], []>} : vector<117x32xbf16>, vector<32x64xbf16>, vector<117x64xf32> -> vector<117x64xf32>
    %49 = arith.addf %44, %48 : vector<117x64xf32>
    %50 = vector.extract_strided_slice %28 {offsets = [13, 0], sizes = [117, 32], strides = [1, 1]} : vector<160x32xbf16> to vector<117x32xbf16>
    %c4 = arith.constant 4 : index
    %c0_35 = arith.constant 0 : index
    %c0_36 = arith.constant 0 : index
    %51 = vector.load %arg4[%c4, %c0_35, %c0_36] : memref<16x32x64xbf16, #tpu.memory_space<vmem>>, vector<1x32x64xbf16>
    %52 = vector.shape_cast %51 : vector<1x32x64xbf16> to vector<32x64xbf16>
    %cst_37 = arith.constant dense<0.000000e+00> : vector<117x64xf32>
    %53 = tpu.matmul %50, %52, %cst_37 {dimension_numbers = #tpu.dot_dimension_numbers<[1], [0], [0], [1], [0, 0, 1, 1], [], []>} : vector<117x32xbf16>, vector<32x64xbf16>, vector<117x64xf32> -> vector<117x64xf32>
    %54 = arith.addf %49, %53 : vector<117x64xf32>
    %55 = vector.extract_strided_slice %28 {offsets = [14, 0], sizes = [117, 32], strides = [1, 1]} : vector<160x32xbf16> to vector<117x32xbf16>
    %c5 = arith.constant 5 : index
    %c0_38 = arith.constant 0 : index
    %c0_39 = arith.constant 0 : index
    %56 = vector.load %arg4[%c5, %c0_38, %c0_39] : memref<16x32x64xbf16, #tpu.memory_space<vmem>>, vector<1x32x64xbf16>
    %57 = vector.shape_cast %56 : vector<1x32x64xbf16> to vector<32x64xbf16>
    %cst_40 = arith.constant dense<0.000000e+00> : vector<117x64xf32>
    %58 = tpu.matmul %55, %57, %cst_40 {dimension_numbers = #tpu.dot_dimension_numbers<[1], [0], [0], [1], [0, 0, 1, 1], [], []>} : vector<117x32xbf16>, vector<32x64xbf16>, vector<117x64xf32> -> vector<117x64xf32>
    %59 = arith.addf %54, %58 : vector<117x64xf32>
    %60 = vector.extract_strided_slice %28 {offsets = [15, 0], sizes = [117, 32], strides = [1, 1]} : vector<160x32xbf16> to vector<117x32xbf16>
    %c6 = arith.constant 6 : index
    %c0_41 = arith.constant 0 : index
    %c0_42 = arith.constant 0 : index
    %61 = vector.load %arg4[%c6, %c0_41, %c0_42] : memref<16x32x64xbf16, #tpu.memory_space<vmem>>, vector<1x32x64xbf16>
    %62 = vector.shape_cast %61 : vector<1x32x64xbf16> to vector<32x64xbf16>
    %cst_43 = arith.constant dense<0.000000e+00> : vector<117x64xf32>
    %63 = tpu.matmul %60, %62, %cst_43 {dimension_numbers = #tpu.dot_dimension_numbers<[1], [0], [0], [1], [0, 0, 1, 1], [], []>} : vector<117x32xbf16>, vector<32x64xbf16>, vector<117x64xf32> -> vector<117x64xf32>
    %64 = arith.addf %59, %63 : vector<117x64xf32>
    %65 = vector.extract_strided_slice %28 {offsets = [16, 0], sizes = [117, 32], strides = [1, 1]} : vector<160x32xbf16> to vector<117x32xbf16>
    %c7 = arith.constant 7 : index
    %c0_44 = arith.constant 0 : index
    %c0_45 = arith.constant 0 : index
    %66 = vector.load %arg4[%c7, %c0_44, %c0_45] : memref<16x32x64xbf16, #tpu.memory_space<vmem>>, vector<1x32x64xbf16>
    %67 = vector.shape_cast %66 : vector<1x32x64xbf16> to vector<32x64xbf16>
    %cst_46 = arith.constant dense<0.000000e+00> : vector<117x64xf32>
    %68 = tpu.matmul %65, %67, %cst_46 {dimension_numbers = #tpu.dot_dimension_numbers<[1], [0], [0], [1], [0, 0, 1, 1], [], []>} : vector<117x32xbf16>, vector<32x64xbf16>, vector<117x64xf32> -> vector<117x64xf32>
    %69 = arith.addf %64, %68 : vector<117x64xf32>
    %70 = vector.extract_strided_slice %28 {offsets = [26, 0], sizes = [117, 32], strides = [1, 1]} : vector<160x32xbf16> to vector<117x32xbf16>
    %c8 = arith.constant 8 : index
    %c0_47 = arith.constant 0 : index
    %c0_48 = arith.constant 0 : index
    %71 = vector.load %arg4[%c8, %c0_47, %c0_48] : memref<16x32x64xbf16, #tpu.memory_space<vmem>>, vector<1x32x64xbf16>
    %72 = vector.shape_cast %71 : vector<1x32x64xbf16> to vector<32x64xbf16>
    %cst_49 = arith.constant dense<0.000000e+00> : vector<117x64xf32>
    %73 = tpu.matmul %70, %72, %cst_49 {dimension_numbers = #tpu.dot_dimension_numbers<[1], [0], [0], [1], [0, 0, 1, 1], [], []>} : vector<117x32xbf16>, vector<32x64xbf16>, vector<117x64xf32> -> vector<117x64xf32>
    %74 = arith.addf %69, %73 : vector<117x64xf32>
    %75 = vector.extract_strided_slice %28 {offsets = [27, 0], sizes = [117, 32], strides = [1, 1]} : vector<160x32xbf16> to vector<117x32xbf16>
    %c9 = arith.constant 9 : index
    %c0_50 = arith.constant 0 : index
    %c0_51 = arith.constant 0 : index
    %76 = vector.load %arg4[%c9, %c0_50, %c0_51] : memref<16x32x64xbf16, #tpu.memory_space<vmem>>, vector<1x32x64xbf16>
    %77 = vector.shape_cast %76 : vector<1x32x64xbf16> to vector<32x64xbf16>
    %cst_52 = arith.constant dense<0.000000e+00> : vector<117x64xf32>
    %78 = tpu.matmul %75, %77, %cst_52 {dimension_numbers = #tpu.dot_dimension_numbers<[1], [0], [0], [1], [0, 0, 1, 1], [], []>} : vector<117x32xbf16>, vector<32x64xbf16>, vector<117x64xf32> -> vector<117x64xf32>
    %79 = arith.addf %74, %78 : vector<117x64xf32>
    %80 = vector.extract_strided_slice %28 {offsets = [28, 0], sizes = [117, 32], strides = [1, 1]} : vector<160x32xbf16> to vector<117x32xbf16>
    %c10 = arith.constant 10 : index
    %c0_53 = arith.constant 0 : index
    %c0_54 = arith.constant 0 : index
    %81 = vector.load %arg4[%c10, %c0_53, %c0_54] : memref<16x32x64xbf16, #tpu.memory_space<vmem>>, vector<1x32x64xbf16>
    %82 = vector.shape_cast %81 : vector<1x32x64xbf16> to vector<32x64xbf16>
    %cst_55 = arith.constant dense<0.000000e+00> : vector<117x64xf32>
    %83 = tpu.matmul %80, %82, %cst_55 {dimension_numbers = #tpu.dot_dimension_numbers<[1], [0], [0], [1], [0, 0, 1, 1], [], []>} : vector<117x32xbf16>, vector<32x64xbf16>, vector<117x64xf32> -> vector<117x64xf32>
    %84 = arith.addf %79, %83 : vector<117x64xf32>
    %85 = vector.extract_strided_slice %28 {offsets = [29, 0], sizes = [117, 32], strides = [1, 1]} : vector<160x32xbf16> to vector<117x32xbf16>
    %c11 = arith.constant 11 : index
    %c0_56 = arith.constant 0 : index
    %c0_57 = arith.constant 0 : index
    %86 = vector.load %arg4[%c11, %c0_56, %c0_57] : memref<16x32x64xbf16, #tpu.memory_space<vmem>>, vector<1x32x64xbf16>
    %87 = vector.shape_cast %86 : vector<1x32x64xbf16> to vector<32x64xbf16>
    %cst_58 = arith.constant dense<0.000000e+00> : vector<117x64xf32>
    %88 = tpu.matmul %85, %87, %cst_58 {dimension_numbers = #tpu.dot_dimension_numbers<[1], [0], [0], [1], [0, 0, 1, 1], [], []>} : vector<117x32xbf16>, vector<32x64xbf16>, vector<117x64xf32> -> vector<117x64xf32>
    %89 = arith.addf %84, %88 : vector<117x64xf32>
    %90 = vector.extract_strided_slice %28 {offsets = [39, 0], sizes = [117, 32], strides = [1, 1]} : vector<160x32xbf16> to vector<117x32xbf16>
    %c12 = arith.constant 12 : index
    %c0_59 = arith.constant 0 : index
    %c0_60 = arith.constant 0 : index
    %91 = vector.load %arg4[%c12, %c0_59, %c0_60] : memref<16x32x64xbf16, #tpu.memory_space<vmem>>, vector<1x32x64xbf16>
    %92 = vector.shape_cast %91 : vector<1x32x64xbf16> to vector<32x64xbf16>
    %cst_61 = arith.constant dense<0.000000e+00> : vector<117x64xf32>
    %93 = tpu.matmul %90, %92, %cst_61 {dimension_numbers = #tpu.dot_dimension_numbers<[1], [0], [0], [1], [0, 0, 1, 1], [], []>} : vector<117x32xbf16>, vector<32x64xbf16>, vector<117x64xf32> -> vector<117x64xf32>
    %94 = arith.addf %89, %93 : vector<117x64xf32>
    %95 = vector.extract_strided_slice %28 {offsets = [40, 0], sizes = [117, 32], strides = [1, 1]} : vector<160x32xbf16> to vector<117x32xbf16>
    %c13 = arith.constant 13 : index
    %c0_62 = arith.constant 0 : index
    %c0_63 = arith.constant 0 : index
    %96 = vector.load %arg4[%c13, %c0_62, %c0_63] : memref<16x32x64xbf16, #tpu.memory_space<vmem>>, vector<1x32x64xbf16>
    %97 = vector.shape_cast %96 : vector<1x32x64xbf16> to vector<32x64xbf16>
    %cst_64 = arith.constant dense<0.000000e+00> : vector<117x64xf32>
    %98 = tpu.matmul %95, %97, %cst_64 {dimension_numbers = #tpu.dot_dimension_numbers<[1], [0], [0], [1], [0, 0, 1, 1], [], []>} : vector<117x32xbf16>, vector<32x64xbf16>, vector<117x64xf32> -> vector<117x64xf32>
    %99 = arith.addf %94, %98 : vector<117x64xf32>
    %100 = vector.extract_strided_slice %28 {offsets = [41, 0], sizes = [117, 32], strides = [1, 1]} : vector<160x32xbf16> to vector<117x32xbf16>
    %c14 = arith.constant 14 : index
    %c0_65 = arith.constant 0 : index
    %c0_66 = arith.constant 0 : index
    %101 = vector.load %arg4[%c14, %c0_65, %c0_66] : memref<16x32x64xbf16, #tpu.memory_space<vmem>>, vector<1x32x64xbf16>
    %102 = vector.shape_cast %101 : vector<1x32x64xbf16> to vector<32x64xbf16>
    %cst_67 = arith.constant dense<0.000000e+00> : vector<117x64xf32>
    %103 = tpu.matmul %100, %102, %cst_67 {dimension_numbers = #tpu.dot_dimension_numbers<[1], [0], [0], [1], [0, 0, 1, 1], [], []>} : vector<117x32xbf16>, vector<32x64xbf16>, vector<117x64xf32> -> vector<117x64xf32>
    %104 = arith.addf %99, %103 : vector<117x64xf32>
    %105 = vector.extract_strided_slice %28 {offsets = [42, 0], sizes = [117, 32], strides = [1, 1]} : vector<160x32xbf16> to vector<117x32xbf16>
    %c15 = arith.constant 15 : index
    %c0_68 = arith.constant 0 : index
    %c0_69 = arith.constant 0 : index
    %106 = vector.load %arg4[%c15, %c0_68, %c0_69] : memref<16x32x64xbf16, #tpu.memory_space<vmem>>, vector<1x32x64xbf16>
    %107 = vector.shape_cast %106 : vector<1x32x64xbf16> to vector<32x64xbf16>
    %cst_70 = arith.constant dense<0.000000e+00> : vector<117x64xf32>
    %108 = tpu.matmul %105, %107, %cst_70 {dimension_numbers = #tpu.dot_dimension_numbers<[1], [0], [0], [1], [0, 0, 1, 1], [], []>} : vector<117x32xbf16>, vector<32x64xbf16>, vector<117x64xf32> -> vector<117x64xf32>
    %109 = arith.addf %104, %108 : vector<117x64xf32>
    %c0_71 = arith.constant 0 : index
    %c0_72 = arith.constant 0 : index
    %110 = vector.load %arg5[%c0_71, %c0_72] : memref<1x64xf32, #tpu.memory_space<vmem>>, vector<1x64xf32>
    %111 = vector.broadcast %110 : vector<1x64xf32> to vector<117x64xf32>
    %112 = arith.addf %109, %111 : vector<117x64xf32>
    %cst_73 = arith.constant 0.000000e+00 : f32
    %113 = vector.broadcast %cst_73 : f32 to vector<117x64xf32>
    %114 = arith.maximumf %112, %113 : vector<117x64xf32>
    %115 = arith.truncf %114 : vector<117x64xf32> to vector<117x64xbf16>
    %c0_74 = arith.constant 0 : index
    %c0_75 = arith.constant 0 : index
    %116 = vector.load %arg8[%c0_74, %c0_75] : memref<27x117xbf16, #tpu.memory_space<vmem>>, vector<27x117xbf16>
    %cst_76 = arith.constant dense<0.000000e+00> : vector<27x64xf32>
    %117 = tpu.matmul %116, %115, %cst_76 {dimension_numbers = #tpu.dot_dimension_numbers<[1], [0], [0], [1], [0, 0, 1, 1], [], []>} : vector<27x117xbf16>, vector<117x64xbf16>, vector<27x64xf32> -> vector<27x64xf32>
    %118 = arith.truncf %117 : vector<27x64xf32> to vector<27x64xbf16>
    %cst_77 = arith.constant 0.000000e+00 : f32
    %119 = vector.broadcast %cst_77 : f32 to vector<15x64xf32>
    %120 = vector.extract_strided_slice %118 {offsets = [0, 0], sizes = [15, 64], strides = [1, 1]} : vector<27x64xbf16> to vector<15x64xbf16>
    %c0_78 = arith.constant 0 : index
    %c0_79 = arith.constant 0 : index
    %c0_80 = arith.constant 0 : index
    %121 = vector.load %arg6[%c0_78, %c0_79, %c0_80] : memref<9x64x64xbf16, #tpu.memory_space<vmem>>, vector<1x64x64xbf16>
    %122 = vector.shape_cast %121 : vector<1x64x64xbf16> to vector<64x64xbf16>
    %cst_81 = arith.constant dense<0.000000e+00> : vector<15x64xf32>
    %123 = tpu.matmul %120, %122, %cst_81 {dimension_numbers = #tpu.dot_dimension_numbers<[1], [0], [0], [1], [0, 0, 1, 1], [], []>} : vector<15x64xbf16>, vector<64x64xbf16>, vector<15x64xf32> -> vector<15x64xf32>
    %124 = arith.addf %119, %123 : vector<15x64xf32>
    %125 = vector.extract_strided_slice %118 {offsets = [1, 0], sizes = [15, 64], strides = [1, 1]} : vector<27x64xbf16> to vector<15x64xbf16>
    %c1_82 = arith.constant 1 : index
    %c0_83 = arith.constant 0 : index
    %c0_84 = arith.constant 0 : index
    %126 = vector.load %arg6[%c1_82, %c0_83, %c0_84] : memref<9x64x64xbf16, #tpu.memory_space<vmem>>, vector<1x64x64xbf16>
    %127 = vector.shape_cast %126 : vector<1x64x64xbf16> to vector<64x64xbf16>
    %cst_85 = arith.constant dense<0.000000e+00> : vector<15x64xf32>
    %128 = tpu.matmul %125, %127, %cst_85 {dimension_numbers = #tpu.dot_dimension_numbers<[1], [0], [0], [1], [0, 0, 1, 1], [], []>} : vector<15x64xbf16>, vector<64x64xbf16>, vector<15x64xf32> -> vector<15x64xf32>
    %129 = arith.addf %124, %128 : vector<15x64xf32>
    %130 = vector.extract_strided_slice %118 {offsets = [2, 0], sizes = [15, 64], strides = [1, 1]} : vector<27x64xbf16> to vector<15x64xbf16>
    %c2_86 = arith.constant 2 : index
    %c0_87 = arith.constant 0 : index
    %c0_88 = arith.constant 0 : index
    %131 = vector.load %arg6[%c2_86, %c0_87, %c0_88] : memref<9x64x64xbf16, #tpu.memory_space<vmem>>, vector<1x64x64xbf16>
    %132 = vector.shape_cast %131 : vector<1x64x64xbf16> to vector<64x64xbf16>
    %cst_89 = arith.constant dense<0.000000e+00> : vector<15x64xf32>
    %133 = tpu.matmul %130, %132, %cst_89 {dimension_numbers = #tpu.dot_dimension_numbers<[1], [0], [0], [1], [0, 0, 1, 1], [], []>} : vector<15x64xbf16>, vector<64x64xbf16>, vector<15x64xf32> -> vector<15x64xf32>
    %134 = arith.addf %129, %133 : vector<15x64xf32>
    %135 = vector.extract_strided_slice %118 {offsets = [5, 0], sizes = [15, 64], strides = [1, 1]} : vector<27x64xbf16> to vector<15x64xbf16>
    %c3_90 = arith.constant 3 : index
    %c0_91 = arith.constant 0 : index
    %c0_92 = arith.constant 0 : index
    %136 = vector.load %arg6[%c3_90, %c0_91, %c0_92] : memref<9x64x64xbf16, #tpu.memory_space<vmem>>, vector<1x64x64xbf16>
    %137 = vector.shape_cast %136 : vector<1x64x64xbf16> to vector<64x64xbf16>
    %cst_93 = arith.constant dense<0.000000e+00> : vector<15x64xf32>
    %138 = tpu.matmul %135, %137, %cst_93 {dimension_numbers = #tpu.dot_dimension_numbers<[1], [0], [0], [1], [0, 0, 1, 1], [], []>} : vector<15x64xbf16>, vector<64x64xbf16>, vector<15x64xf32> -> vector<15x64xf32>
    %139 = arith.addf %134, %138 : vector<15x64xf32>
    %140 = vector.extract_strided_slice %118 {offsets = [6, 0], sizes = [15, 64], strides = [1, 1]} : vector<27x64xbf16> to vector<15x64xbf16>
    %c4_94 = arith.constant 4 : index
    %c0_95 = arith.constant 0 : index
    %c0_96 = arith.constant 0 : index
    %141 = vector.load %arg6[%c4_94, %c0_95, %c0_96] : memref<9x64x64xbf16, #tpu.memory_space<vmem>>, vector<1x64x64xbf16>
    %142 = vector.shape_cast %141 : vector<1x64x64xbf16> to vector<64x64xbf16>
    %cst_97 = arith.constant dense<0.000000e+00> : vector<15x64xf32>
    %143 = tpu.matmul %140, %142, %cst_97 {dimension_numbers = #tpu.dot_dimension_numbers<[1], [0], [0], [1], [0, 0, 1, 1], [], []>} : vector<15x64xbf16>, vector<64x64xbf16>, vector<15x64xf32> -> vector<15x64xf32>
    %144 = arith.addf %139, %143 : vector<15x64xf32>
    %145 = vector.extract_strided_slice %118 {offsets = [7, 0], sizes = [15, 64], strides = [1, 1]} : vector<27x64xbf16> to vector<15x64xbf16>
    %c5_98 = arith.constant 5 : index
    %c0_99 = arith.constant 0 : index
    %c0_100 = arith.constant 0 : index
    %146 = vector.load %arg6[%c5_98, %c0_99, %c0_100] : memref<9x64x64xbf16, #tpu.memory_space<vmem>>, vector<1x64x64xbf16>
    %147 = vector.shape_cast %146 : vector<1x64x64xbf16> to vector<64x64xbf16>
    %cst_101 = arith.constant dense<0.000000e+00> : vector<15x64xf32>
    %148 = tpu.matmul %145, %147, %cst_101 {dimension_numbers = #tpu.dot_dimension_numbers<[1], [0], [0], [1], [0, 0, 1, 1], [], []>} : vector<15x64xbf16>, vector<64x64xbf16>, vector<15x64xf32> -> vector<15x64xf32>
    %149 = arith.addf %144, %148 : vector<15x64xf32>
    %150 = vector.extract_strided_slice %118 {offsets = [10, 0], sizes = [15, 64], strides = [1, 1]} : vector<27x64xbf16> to vector<15x64xbf16>
    %c6_102 = arith.constant 6 : index
    %c0_103 = arith.constant 0 : index
    %c0_104 = arith.constant 0 : index
    %151 = vector.load %arg6[%c6_102, %c0_103, %c0_104] : memref<9x64x64xbf16, #tpu.memory_space<vmem>>, vector<1x64x64xbf16>
    %152 = vector.shape_cast %151 : vector<1x64x64xbf16> to vector<64x64xbf16>
    %cst_105 = arith.constant dense<0.000000e+00> : vector<15x64xf32>
    %153 = tpu.matmul %150, %152, %cst_105 {dimension_numbers = #tpu.dot_dimension_numbers<[1], [0], [0], [1], [0, 0, 1, 1], [], []>} : vector<15x64xbf16>, vector<64x64xbf16>, vector<15x64xf32> -> vector<15x64xf32>
    %154 = arith.addf %149, %153 : vector<15x64xf32>
    %155 = vector.extract_strided_slice %118 {offsets = [11, 0], sizes = [15, 64], strides = [1, 1]} : vector<27x64xbf16> to vector<15x64xbf16>
    %c7_106 = arith.constant 7 : index
    %c0_107 = arith.constant 0 : index
    %c0_108 = arith.constant 0 : index
    %156 = vector.load %arg6[%c7_106, %c0_107, %c0_108] : memref<9x64x64xbf16, #tpu.memory_space<vmem>>, vector<1x64x64xbf16>
    %157 = vector.shape_cast %156 : vector<1x64x64xbf16> to vector<64x64xbf16>
    %cst_109 = arith.constant dense<0.000000e+00> : vector<15x64xf32>
    %158 = tpu.matmul %155, %157, %cst_109 {dimension_numbers = #tpu.dot_dimension_numbers<[1], [0], [0], [1], [0, 0, 1, 1], [], []>} : vector<15x64xbf16>, vector<64x64xbf16>, vector<15x64xf32> -> vector<15x64xf32>
    %159 = arith.addf %154, %158 : vector<15x64xf32>
    %160 = vector.extract_strided_slice %118 {offsets = [12, 0], sizes = [15, 64], strides = [1, 1]} : vector<27x64xbf16> to vector<15x64xbf16>
    %c8_110 = arith.constant 8 : index
    %c0_111 = arith.constant 0 : index
    %c0_112 = arith.constant 0 : index
    %161 = vector.load %arg6[%c8_110, %c0_111, %c0_112] : memref<9x64x64xbf16, #tpu.memory_space<vmem>>, vector<1x64x64xbf16>
    %162 = vector.shape_cast %161 : vector<1x64x64xbf16> to vector<64x64xbf16>
    %cst_113 = arith.constant dense<0.000000e+00> : vector<15x64xf32>
    %163 = tpu.matmul %160, %162, %cst_113 {dimension_numbers = #tpu.dot_dimension_numbers<[1], [0], [0], [1], [0, 0, 1, 1], [], []>} : vector<15x64xbf16>, vector<64x64xbf16>, vector<15x64xf32> -> vector<15x64xf32>
    %164 = arith.addf %159, %163 : vector<15x64xf32>
    %c0_114 = arith.constant 0 : index
    %c0_115 = arith.constant 0 : index
    %165 = vector.load %arg7[%c0_114, %c0_115] : memref<1x64xf32, #tpu.memory_space<vmem>>, vector<1x64xf32>
    %166 = vector.broadcast %165 : vector<1x64xf32> to vector<15x64xf32>
    %167 = arith.addf %164, %166 : vector<15x64xf32>
    %cst_116 = arith.constant 0.000000e+00 : f32
    %168 = vector.broadcast %cst_116 : f32 to vector<15x64xf32>
    %169 = arith.maximumf %167, %168 : vector<15x64xf32>
    %c0_117 = arith.constant 0 : index
    %c0_118 = arith.constant 0 : index
    %c0_119 = arith.constant 0 : index
    %170 = vector.load %arg9[%c0_117, %c0_118, %c0_119] : memref<1x15x64xf32, #tpu.memory_space<vmem>>, vector<1x15x64xf32>
    %171 = vector.shape_cast %170 : vector<1x15x64xf32> to vector<15x64xf32>
    %172 = vector.shape_cast %169 : vector<15x64xf32> to vector<1x15x64xf32>
    tpu.vector_store %arg9[%c0_117, %c0_118, %c0_119], %172 {strides = array<i32>} : memref<1x15x64xf32, #tpu.memory_space<vmem>>, vector<1x15x64xf32>,
    return
  }
  func.func @transform_0(%arg0: i32) -> (i32, i32, i32) {
    %c0_i32 = arith.constant 0 : i32
    %c0_i32_0 = arith.constant 0 : i32
    %c0_i32_1 = arith.constant 0 : i32
    return %arg0, %c0_i32, %c0_i32_0 : i32, i32, i32
  }
  func.func @transform_1(%arg0: i32) -> (i32, i32, i32) {
    %c0_i32 = arith.constant 0 : i32
    %c0_i32_0 = arith.constant 0 : i32
    %c0_i32_1 = arith.constant 0 : i32
    %c0_i32_2 = arith.constant 0 : i32
    return %c0_i32, %c0_i32_0, %c0_i32_1 : i32, i32, i32
  }
  func.func @transform_2(%arg0: i32) -> (i32, i32) {
    %c0_i32 = arith.constant 0 : i32
    %c0_i32_0 = arith.constant 0 : i32
    %c0_i32_1 = arith.constant 0 : i32
    return %c0_i32, %c0_i32_0 : i32, i32
  }
  func.func @transform_3(%arg0: i32) -> (i32, i32, i32) {
    %c0_i32 = arith.constant 0 : i32
    %c0_i32_0 = arith.constant 0 : i32
    %c0_i32_1 = arith.constant 0 : i32
    %c0_i32_2 = arith.constant 0 : i32
    return %c0_i32, %c0_i32_0, %c0_i32_1 : i32, i32, i32
  }
  func.func @transform_4(%arg0: i32) -> (i32, i32) {
    %c0_i32 = arith.constant 0 : i32
    %c0_i32_0 = arith.constant 0 : i32
    %c0_i32_1 = arith.constant 0 : i32
    return %c0_i32, %c0_i32_0 : i32, i32
  }
  func.func @transform_5(%arg0: i32) -> (i32, i32, i32) {
    %c0_i32 = arith.constant 0 : i32
    %c0_i32_0 = arith.constant 0 : i32
    %c0_i32_1 = arith.constant 0 : i32
    %c0_i32_2 = arith.constant 0 : i32
    return %c0_i32, %c0_i32_0, %c0_i32_1 : i32, i32, i32
  }
  func.func @transform_6(%arg0: i32) -> (i32, i32) {
    %c0_i32 = arith.constant 0 : i32
    %c0_i32_0 = arith.constant 0 : i32
    %c0_i32_1 = arith.constant 0 : i32
    return %c0_i32, %c0_i32_0 : i32, i32
  }
  func.func @transform_7(%arg0: i32) -> (i32, i32) {
    %c0_i32 = arith.constant 0 : i32
    %c0_i32_0 = arith.constant 0 : i32
    %c0_i32_1 = arith.constant 0 : i32
    return %c0_i32, %c0_i32_0 : i32, i32
  }
  func.func @transform_8(%arg0: i32) -> (i32, i32, i32) {
    %c0_i32 = arith.constant 0 : i32
    %c0_i32_0 = arith.constant 0 : i32
    %c0_i32_1 = arith.constant 0 : i32
    return %arg0, %c0_i32, %c0_i32_0 : i32, i32, i32
  }
}

</mosaic_0001>

<bundles_post_ra>
// kernel: conv_encoder_forward.1
= control target key start
LH: loop header
LB: loop body
LE: loop exit
PB: predicated region body
PF: predicated region fallthrough
CT: control target
= control target key end

     0   :  { %s6729_s27 = smov 0   ;;  %s8111_s0 = inlined_call_operand.vmem [shape: bf16[2,176,64], index: 0, kind: input, shape index: {}]   ;;  %s8112_s1 = inlined_call_operand.vmem [shape: bf16[4,64,32], index: 1, kind: input, shape index: {}]   ;;  %s8113_s2 = inlined_call_operand.vmem [shape: f32[1,32], index: 2, kind: input, shape index: {}]   ;;  %s8114_s3 = inlined_call_operand.vmem [shape: bf16[16,32,64], index: 3, kind: input, shape index: {}]   ;;  %s8115_s4 = inlined_call_operand.vmem [shape: f32[1,64], index: 4, kind: input, shape index: {}]   ;;  %s8116_s5 = inlined_call_operand.vmem [shape: bf16[9,64,64], index: 5, kind: input, shape index: {}]   ;;  %s8117_s6 = inlined_call_operand.vmem [shape: f32[1,64], index: 6, kind: input, shape index: {}]   ;;  %s8118_s7 = inlined_call_operand.vmem [shape: bf16[27,117], index: 7, kind: input, shape index: {}]   ;;  %s8119_s8 = inlined_call_operand.vmem [shape: f32[2,15,64], index: 8, kind: output, shape index: {}]  }
   0x1 LB: > { %s5033_s28 = sadd.s32 4294967295, %s6679_s27   ;;  %p5037_p0 = scmp.ge.s32.totalorder %s6679_s27, 1  ;;  %s6679_s27 = sphi %s6729_s27, %s18_s27  }
   0x2   : > { %p262_p1 = scmp.lt.s32.totalorder %s6679_s27, 3 }
   0x4   : > { %p263_p2 = pnand %p5037_p0, %p262_p1 }
   0x6   : > { %266 = sbr.rel (%p263_p2) target bundleno = 1598 (0x63e), region = 52 }
   0xd   : > { %v6565_v0 = vld [vmem:[%s8112_s1 + $0x20] sm:$0xff]   ;;  %p296_p3 = scmp.lt.s32.totalorder %s5033_s28, 1  ;;  %v6566_v1 = vld [vmem:[%s8112_s1 + $0x28] sm:$0xff]   ;;  %v6567_v2 = vld [vmem:[%s8112_s1 + $0x30] sm:$0xff]   ;;  %vm399_vm0 = vsmask.f32 7424 }
   0xe   : > { %5753 = vmatprep.subr.bf16.mxu0 %v6565_v0  ;;  %v6568_v3 = vld [vmem:[%s8112_s1 + $0x38] sm:$0xff]   ;;  %vm508_vm1 = vcmask 523264   ;;  %v6574_v30 = vld [vmem:[%s8112_s1] sm:$0xff]   ;;  %v6578_v48 = vld [vmem:[%s8112_s1 + $0x8] sm:$0xff]   ;;  %vm831_vm2 = vsmask.f32 5376 }
   0xf   : > { %s8146_s28 = smov (!%p296_p3, %s5033_s28), 1  ;;  %5754 = vmatpush3.bf16.msra.mxu0 %v6565_v0  ;;  %vm1126_vm3 = vcmask 1044480   ;;  %vm1902_vm4 = vsmask.f32 6400  ;;  %vm1476_vm5 = vcmask 261120   ;;  %vm1734_vm9 = vcmask 1046528  }
  0x10   : > { %5755 = vmatprep.subr.bf16.mxu0 %v6566_v1  ;;  %s6553_s13 = smul.u32 88, %s8146_s28  ;;  %vm2086_vm6 = vsmask.f32 1280  ;;  %vm2450_vm7 = vsmask.f32 256  ;;  %vm2280_vm10 = vcmask 1040384  }
  0x11   : > { %vm2926_vm8 = vsmask.f32 2304  ;;  %vm3421_vm11 = vsmask.f32 4352  ;;  %vm3773_vm12 = vsmask.f32 3328 }
  0x12   : > { %s6755_s18 = scalar_lea.vmem %s8111_s0, %s6553_s13  ;;  %vm2758_vm13 = vcmask 1042432   ;;  %vm3111_vm14 = vcmask 1041408   ;;  %vm3605_vm15 = vcmask 1043456   ;;  %s5481_s9 = sshll.u32 %s8146_s28, 4 }
  0x13   : > { %5756 = vmatpush3.bf16.msra.mxu0 %v6566_v1  ;;  %v307_v4 = vld [vmem:[%s6755_s18] sm:$0xf]  ;;  %v308_v5 = vld [vmem:[%s6755_s18 + $0x4] sm:$0xf]  ;;  %v309_v6 = vld [vmem:[%s6755_s18 + $0x8] sm:$0xf]  ;;  %s305_s12 = scalar_lea.vmem %s8119_s8, %s5481_s9 }
  0x14   : > { %5757 = vmatprep.subr.bf16.mxu0 %v6567_v2  ;;  %v310_v7 = vld [vmem:[%s6755_s18 + $0xc] sm:$0xf]  ;;  %v311_v8 = vld [vmem:[%s6755_s18 + $0x10] sm:$0xf]  ;;  %v6762_v9 = vcombine.low %v307_v4, %v308_v5  ;;  %v6764_v10 = vcombine.low %v308_v5, %v309_v6  ;;  %v312_v11 = vld [vmem:[%s6755_s18 + $0x14] sm:$0xf] }
  0x15   : > { %v6767_v12 = vcombine.low %v309_v6, %v310_v7  ;;  %v6769_v13 = vcombine.low %v310_v7, %v311_v8  ;;  %v6771_v14 = vcombine.low %v311_v8, %v312_v11  ;;  %v313_v15 = vld [vmem:[%s6755_s18 + $0x18] sm:$0xf]  ;;  %v314_v16 = vld [vmem:[%s6755_s18 + $0x1c] sm:$0xf]  ;;  %v315_v17 = vld [vmem:[%s6755_s18 + $0x20] sm:$0xf] }
  0x16   : > { %v401_v18 = vshrl.u32 %v6762_v9, 16  ;;  %v403_v19 = vshll.u32 %v6762_v9, 16  ;;  %v6778_v20 = vcombine.low %v313_v15, %v314_v16  ;;  %v6780_v21 = vcombine.low %v312_v11, %v313_v15  ;;  %v6783_v22 = vld [vmem:[%s6755_s18 + $0x24] sm:$0xf]  ;;  %v6786_v23 = vld [vmem:[%s6755_s18 + $0x28] sm:$0xf] }
  0x17   : > { %5758 = vmatpush3.bf16.msra.mxu0 %v6567_v2  ;;  %v408_v24 = vshll.u32 %v6767_v12, 16  ;;  %v412_v25 = vshrl.u32 %v6767_v12, 16  ;;  %v416_v26 = vshll.u32 %v6771_v14, 16  ;;  %v420_v27 = vshrl.u32 %v6771_v14, 16  ;;  %v6793_v28 = vld [vmem:[%s6755_s18 + $0x2c] sm:$0xf] }
  0x18   : > { %5759 = vmatprep.subr.bf16.mxu0 %v6568_v3  ;;  %v405_v29 = vrot.slane %v403_v19, 1  ;;  %v424_v31 = vshll.u32 %v6778_v20, 16  ;;  %v6800_v32 = vcombine.low %v315_v17, %v6783_v22  ;;  %v428_v33 = vshrl.u32 %v6778_v20, 16  ;;  %v6804_v34 = vld [vmem:[%s6755_s18 + $0x30] sm:$0xf] }
  0x19   : > { %v410_v35 = vrot.slane %v408_v24, 1  ;;  %v418_v36 = vrot.slane %v416_v26, 1  ;;  %v6808_v37 = vcombine.low %v6786_v23, %v6793_v28  ;;  %v6811_v38 = vld [vmem:[%s6755_s18 + $0x34] sm:$0xf]  ;;  %v6814_v39 = vld [vmem:[%s6755_s18 + $0x38] sm:$0xf]  ;;  %v6816_v40 = vcombine.low %v314_v16, %v315_v17 }
  0x1a   : > { %v406_v41 = vor.u32 %v405_v29, %v401_v18  ;;  %v426_v42 = vrot.slane %v424_v31, 1  ;;  %v432_v43 = vshll.u32 %v6800_v32, 16  ;;  %v436_v44 = vshrl.u32 %v6800_v32, 16  ;;  %v6821_v45 = vld [vmem:[%s6755_s18 + $0x3c] sm:$0xf]  ;;  %v6581_v5 = vld [vmem:[%s8112_s1 + $0x10] sm:$0xff]  }
  0x1b   : > { %5760 = vmatpush3.bf16.msra.mxu0 %v6568_v3  ;;  %v414_v46 = vor.u32 %v412_v25, %v410_v35  ;;  %v422_v47 = vor.u32 %v420_v27, %v418_v36  ;;  %v440_v49 = vshll.u32 %v6808_v37, 16  ;;  %v6829_v50 = vcombine.low %v6804_v34, %v6811_v38  ;;  %v6832_v51 = vld [vmem:[%s6755_s18 + $0x40] sm:$0xf]  ;;  %v6835_v52 = vld [vmem:[%s6755_s18 + $0x44] sm:$0xf]  ;;  %v6584_v31 = vld [vmem:[%s8112_s1 + $0x18] sm:$0xff]  }
  0x1c   : > { %v411_v53 = vsel %vm399_vm0, %v406_v41, %v410_v35  ;;  %5781 = vmatprep.subr.bf16.mxu0 %v6574_v30  ;;  %v430_v54 = vor.u32 %v428_v33, %v426_v42  ;;  %v434_v55 = vrot.slane %v432_v43, 1  ;;  %v444_v56 = vshrl.u32 %v6808_v37, 16  ;;  %v6844_v61 = vld [vmem:[%s6755_s18 + $0x48] sm:$0xf]  ;;  %v326_v62 = vld [vmem:[%s6755_s18 + $0x4c] sm:$0xf] }
  0x1d   : > { %5761 = vmatprep.mubr.msk.bf16.mxu0 %vm508_vm1, %v411_v53  ;;  %v419_v57 = vsel %vm399_vm0, %v414_v46, %v418_v36  ;;  %v427_v58 = vsel %vm399_vm0, %v422_v47, %v426_v42  ;;  %v442_v59 = vrot.slane %v440_v49, 1  ;;  %v448_v60 = vshll.u32 %v6829_v50, 16  ;;  %v327_v2 = vld [vmem:[%s6755_s18 + $0x50] sm:$0xf] }
  0x1e   : > { %5762 = vmatmul.mubr.msk.bf16.vlgmr.msra.gmra.mrb[0].mxu0 %vm508_vm1, %v419_v57  ;;  %v438_v63 = vor.u32 %v436_v44, %v434_v55  ;;  %v6850_v0 = vcombine.low %v6814_v39, %v6821_v45  ;;  %v452_v1 = vshrl.u32 %v6829_v50, 16  ;;  %v435_v3 = vsel %vm399_vm0, %v430_v54, %v434_v55 }
  0x1f   : > { %5782 = vmatpush3.bf16.msra.mxu0 %v6574_v30  ;;  %5765 = vmatprep.mubr.msk.bf16.mxu0 %vm508_vm1, %v427_v58  ;;  %v450_v4 = vrot.slane %v448_v60, 1  ;;  %v6861_v6 = vcombine.low %v6832_v51, %v6835_v52  ;;  %v6864_v7 = vcombine.low %v6844_v61, %v326_v62  ;;  %v446_v8 = vor.u32 %v444_v56, %v442_v59 }
  0x20   : > { %5783 = vmatprep.subr.bf16.mxu0 %v6578_v48  ;;  %v456_v11 = vshll.u32 %v6850_v0, 16  ;;  %v460_v15 = vshrl.u32 %v6850_v0, 16  ;;  %v5059_v16 = vcombine.low %v327_v2, %v327_v2  ;;  %v443_v17 = vsel %vm399_vm0, %v438_v63, %v442_v59 }
  0x21   : > { %v454_v18 = vor.u32 %v452_v1, %v450_v4  ;;  %v464_v19 = vshll.u32 %v6861_v6, 16  ;;  %v468_v24 = vshrl.u32 %v6861_v6, 16  ;;  %v472_v26 = vshll.u32 %v6864_v7, 16 }
  0x22   : > { %v458_v25 = vrot.slane %v456_v11, 1  ;;  %v476_v27 = vshrl.u32 %v6864_v7, 16  ;;  %v6873_v29 = vshll.u32 %v5059_v16, 16  ;;  %v6878_v33 = vcombine.low %v326_v62, %v327_v2  ;;  %v6902_v62 = vld [vmem:[%s8112_s1 + $0x40] sm:$0xff]  }
  0x23   : > { %5784 = vmatpush3.bf16.msra.mxu0 %v6578_v48  ;;  %v466_v30 = vrot.slane %v464_v19, 1  ;;  %v833_v35 = vshrl.u32 %v6764_v10, 16  ;;  %v451_v36 = vsel %vm399_vm0, %v446_v8, %v450_v4  ;;  %v474_v42 = vrot.slane %v472_v26, 1 }
  0x24   : > { %5785 = vmatprep.subr.bf16.mxu0 %v6581_v5  ;;  %v462_v41 = vor.u32 %v460_v15, %v458_v25  ;;  %v482_v43 = vrot.slane %v6873_v29, 1  ;;  %v836_v47 = vshll.u32 %v6764_v10, 16  ;;  %v841_v48 = vshrl.u32 %v6769_v13, 16  ;;  %v6589_v29 = vld [vmem:[%s8112_s1 + $0x48] sm:$0xff]  }
  0x25   : > { %v470_v44 = vor.u32 %v468_v24, %v466_v30  ;;  %v835_v46 = vrot.slane %v833_v35, 2  ;;  %v459_v49 = vsel %vm399_vm0, %v454_v18, %v458_v25  ;;  %v844_v54 = vshll.u32 %v6769_v13, 16 }
  0x26   : > { %5766 = vmatmul.mubr.msk.bf16.gmra.mrb[4].mxu0 %vm508_vm1, %v435_v3  ;;  %v6888_v53 = vsel %vm399_vm0, %v462_v41, %v466_v30  ;;  %v850_v55 = vshrl.u32 %v6780_v21, 16  ;;  %v6893_v56 = vor.u32 %v476_v27, %v474_v42  ;;  %v838_v57 = vrot.slane %v836_v47, 3 }
  0x27   : > { %5769 = vmatprep.mubr.msk.bf16.mxu0 %vm508_vm1, %v443_v17  ;;  %5786 = vmatpush3.bf16.msra.mxu0 %v6581_v5  ;;  %v843_v58 = vrot.slane %v841_v48, 2  ;;  %v853_v59 = vshll.u32 %v6780_v21, 16  ;;  %v6897_v60 = vsel %vm399_vm0, %v470_v44, %v474_v42  ;;  %v846_v63 = vrot.slane %v844_v54, 3  ;;  %v6602_v42 = vld [vmem:[%s6755_s18 + $0x54] ss:$0 sps:$4 sm:$0xff]  }
  0x28   : > { %5787 = vmatprep.subr.bf16.mxu0 %v6584_v31  ;;  %v852_v1 = vrot.slane %v850_v55, 2  ;;  %v859_v2 = vshrl.u32 %v6816_v40, 16  ;;  %v839_v3 = vor.u32 %v838_v57, %v835_v46  ;;  %v862_v5 = vshll.u32 %v6816_v40, 16 }
  0x29   : > { %v855_v4 = vrot.slane %v853_v59, 3  ;;  %v6908_v8 = vcombine.low %v6783_v22, %v6786_v23  ;;  %v847_v11 = vor.u32 %v846_v63, %v843_v58  ;;  %v6912_v16 = vcombine.low %v6793_v28, %v6804_v34 }
  0x2a   : > { %v861_v15 = vrot.slane %v859_v2, 2  ;;  %v6916_v17 = vcombine.low %v6811_v38, %v6814_v39  ;;  %v864_v19 = vrot.slane %v862_v5, 3  ;;  %v5103_v47 = vcombine.low %v6821_v45, %v6832_v51 }
  0x2b   : > { %5788 = vmatpush3.bf16.msra.mxu0 %v6584_v31  ;;  %v856_v18 = vor.u32 %v855_v4, %v852_v1  ;;  %v868_v24 = vshrl.u32 %v6908_v8, 16  ;;  %v871_v25 = vshll.u32 %v6908_v8, 16  ;;  %v6922_v22 = vsel %vm831_vm2, %v839_v3, %v847_v11 }
  0x2c   : > { %5809 = vmatprep.subr.bf16.mxu0 %v6902_v62  ;;  %v877_v23 = vshrl.u32 %v6912_v16, 16  ;;  %v880_v28 = vshll.u32 %v6912_v16, 16  ;;  %v886_v34 = vshrl.u32 %v6916_v17, 16  ;;  %v865_v39 = vor.u32 %v864_v19, %v861_v15 }
  0x2d   : > { %v6928_v38 = vsel %vm831_vm2, %v847_v11, %v856_v18  ;;  %v870_v26 = vrot.slane %v868_v24, 2  ;;  %v873_v27 = vrot.slane %v871_v25, 3  ;;  %v889_v41 = vshll.u32 %v6916_v17, 16 }
  0x2e   : > { %5770 = vmatmul.mubr.msk.bf16.gmra.mrb[8].mxu0 %vm508_vm1, %v451_v36  ;;  %v879_v30 = vrot.slane %v877_v23, 2  ;;  %v882_v31 = vrot.slane %v880_v28, 3  ;;  %v888_v35 = vrot.slane %v886_v34, 2  ;;  %v6935_v44 = vsel %vm831_vm2, %v856_v18, %v865_v39 }
  0x2f   : > { %5773 = vmatprep.mubr.msk.bf16.mxu0 %vm508_vm1, %v459_v49  ;;  %v874_v46 = vor.u32 %v873_v27, %v870_v26  ;;  %v5104_v48 = vcombine.low %v6835_v52, %v6844_v61  ;;  %v891_v36 = vrot.slane %v889_v41, 3  ;;  %v913_v55 = vshrl.u32 %v6878_v33, 16 }
  0x30   : > { %v883_v54 = vor.u32 %v882_v31, %v879_v30  ;;  %v916_v57 = vshll.u32 %v6878_v33, 16  ;;  %v895_v49 = vshrl.u32 %v5103_v47, 16  ;;  %v898_v59 = vshll.u32 %v5103_v47, 16 }
  0x31   : > { %v6944_v58 = vsel %vm831_vm2, %v865_v39, %v874_v46  ;;  %v904_v63 = vshrl.u32 %v5104_v48, 16  ;;  %v892_v2 = vor.u32 %v891_v36, %v888_v35  ;;  %v907_v45 = vshll.u32 %v5104_v48, 16 }
  0x32   : > { %v6947_v1 = vsel %vm831_vm2, %v874_v46, %v883_v54  ;;  %v915_v51 = vrot.slane %v913_v55, 2  ;;  %v897_v3 = vrot.slane %v895_v49, 2  ;;  %v900_v52 = vrot.slane %v898_v59, 3 }
  0x33   : > { %v906_v61 = vrot.slane %v904_v63, 2  ;;  %v918_v4 = vrot.slane %v916_v57, 3  ;;  %v6950_v5 = vsel %vm831_vm2, %v883_v54, %v892_v2  ;;  %v909_v11 = vrot.slane %v907_v45, 3 }
  0x34   : > { %v922_v15 = vshrl.u32 %v6602_v42, 16  ;;  %v925_v18 = vshll.u32 %v6602_v42, 16  ;;  %v901_v19 = vor.u32 %v900_v52, %v897_v3  ;;  %v1127_v25 = vrot.slane %v6764_v10, 3 }
  0x35   : > { %v919_v24 = vor.u32 %v918_v4, %v915_v51  ;;  %v1128_v23 = vrot.slane %v6769_v13, 3  ;;  %v910_v28 = vor.u32 %v909_v11, %v906_v61  ;;  %v1130_v26 = vrot.slane %v6780_v21, 3 }
  0x36   : > { %5774 = vmatmul.mubr.msk.bf16.gmra.mrb[12].mxu0 %vm508_vm1, %v6888_v53  ;;  %v924_v34 = vrot.slane %v922_v15, 2  ;;  %v927_v39 = vrot.slane %v925_v18, 3  ;;  %v6960_v27 = vsel %vm831_vm2, %v892_v2, %v901_v19  ;;  %v1132_v10 = vrot.slane %v6816_v40, 3 }
  0x37   : > { %5777 = vmatprep.mubr.msk.bf16.mxu0 %vm508_vm1, %v6897_v60  ;;  %v6963_v30 = vsel %vm1126_vm3, %v1127_v25, %v1128_v23  ;;  %v1134_v13 = vrot.slane %v6908_v8, 3  ;;  %v911_v53 = vsel %vm831_vm2, %v901_v19, %v910_v28  ;;  %v920_v31 = vsel %vm831_vm2, %v910_v28, %v919_v24 }
  0x38   : > { %v928_v35 = vor.u32 %v927_v39, %v924_v34  ;;  %v1131_v21 = vsel %vm1126_vm3, %v1128_v23, %v1130_v26  ;;  %v1133_v41 = vsel %vm1126_vm3, %v1130_v26, %v1132_v10  ;;  %v1136_v46 = vrot.slane %v6912_v16, 3 }
  0x39   : > { %v1135_v60 = vsel %vm1126_vm3, %v1132_v10, %v1134_v13  ;;  %v1138_v54 = vrot.slane %v6916_v17, 3  ;;  %v1140_v40 = vrot.slane %v5103_v47, 3  ;;  %v1142_v55 = vrot.slane %v5104_v48, 3 }
  0x3a   : > { %v929_v36 = vsel %vm831_vm2, %v919_v24, %v928_v35  ;;  %v1144_v8 = vrot.slane %v6878_v33, 3  ;;  %v483_v57 = vsel %vm399_vm0, %v6893_v56, %v482_v43  ;;  %v1137_v49 = vsel %vm1126_vm3, %v1134_v13, %v1136_v46  ;;  %v6590_v33 = vld [vmem:[%s8112_s1 + $0x50] sm:$0xff]   ;;  %v7078_v43 = vld [vmem:[%s8114_s3] sm:$0xff]  }
  0x3b   : > { %v1139_v59 = vsel %vm1126_vm3, %v1136_v46, %v1138_v54  ;;  %v1146_v63 = vrot.slane %v6602_v42, 3  ;;  %v1141_v16 = vsel %vm1126_vm3, %v1138_v54, %v1140_v40  ;;  %v1143_v17 = vsel %vm1126_vm3, %v1140_v40, %v1142_v55  ;;  %v7084_v56 = vld [vmem:[%s8113_s2] ss:$0 sm:$0xff] }
  0x3c   : > { %v1145_v2 = vsel %vm1126_vm3, %v1142_v55, %v1144_v8 }
  0x3d   : > { %v1147_v47 = vsel %vm1126_vm3, %v1144_v8, %v1146_v63 }
  0x3e   : > { %5778 = vmatmul.mubr.msk.bf16.gmra.mrb[16].mxu0 %vm508_vm1, %v483_v57 }
  0x3f   : > { %5789 = vmatprep.mubr.msk.bf16.mxu0 %vm508_vm1, %v6762_v9  ;;  %v6591_v9 = vld [vmem:[%s8112_s1 + $0x58] sm:$0xff]  }
  0x46   : > { %5790 = vmatmul.mubr.msk.bf16.vlgmr.msra.gmra.mrb[0].mxu0 %vm508_vm1, %v6767_v12  ;;  %v6592_v12 = vld [vmem:[%s8112_s1 + $0x60] sm:$0xff]  }
  0x47   : > { %5810 = vmatpush3.bf16.msra.mxu0 %v6902_v62  ;;  %5793 = vmatprep.mubr.msk.bf16.mxu0 %vm508_vm1, %v6771_v14  ;;  %v6595_v14 = vld [vmem:[%s8112_s1 + $0x68] sm:$0xff]  }
  0x48   : > { %5811 = vmatprep.subr.bf16.mxu0 %v6589_v29 }
  0x4b   : > { %5812 = vmatpush3.bf16.msra.mxu0 %v6589_v29 }
  0x4c   : > { %5813 = vmatprep.subr.bf16.mxu0 %v6590_v33 }
  0x4e   : > { %5794 = vmatmul.mubr.msk.bf16.gmra.mrb[4].mxu0 %vm508_vm1, %v6778_v20  ;;  %v6598_v20 = vld [vmem:[%s8112_s1 + $0x70] sm:$0xff]  }
  0x4f   : > { %5797 = vmatprep.mubr.msk.bf16.mxu0 %vm508_vm1, %v6800_v32  ;;  %5814 = vmatpush3.bf16.msra.mxu0 %v6590_v33  ;;  %v6601_v32 = vld [vmem:[%s8112_s1 + $0x78] sm:$0xff]  }
  0x50   : > { %5815 = vmatprep.subr.bf16.mxu0 %v6591_v9 }
  0x53   : > { %5816 = vmatpush3.bf16.msra.mxu0 %v6591_v9 }
  0x54   : > { %5837 = vmatprep.subr.bf16.mxu0 %v6592_v12 }
  0x56   : > { %5798 = vmatmul.mubr.msk.bf16.gmra.mrb[8].mxu0 %vm508_vm1, %v6808_v37  ;;  %v6603_v37 = vld [vmem:[%s8114_s3 + $0x10] sm:$0xff]  }
  0x57   : > { %5801 = vmatprep.mubr.msk.bf16.mxu0 %vm508_vm1, %v6829_v50  ;;  %v6604_v50 = vld [vmem:[%s8114_s3 + $0x30] sm:$0xff]  }
  0x58   : > { %5925 = vmatprep.subr.bf16.mxu1 %v6604_v50 }
  0x59   : > { %5926 = vmatpush3.bf16.msra.mxu1 %v6604_v50 }
  0x5e   : > { %5802 = vmatmul.mubr.msk.bf16.gmra.mrb[12].mxu0 %vm508_vm1, %v6850_v0  ;;  %v6605_v0 = vld [vmem:[%s8114_s3 + $0x18] sm:$0xff]  }
  0x5f   : > { %5805 = vmatprep.mubr.msk.bf16.mxu0 %vm508_vm1, %v6861_v6  ;;  %v6606_v6 = vld [vmem:[%s8114_s3 + $0x38] sm:$0xff]  }
  0x60   : > { %5927 = vmatprep.subr.bf16.mxu1 %v6606_v6 }
  0x61   : > { %5928 = vmatpush3.bf16.msra.mxu1 %v6606_v6 }
  0x66   : > { %5806 = vmatmul.mubr.msk.bf16.gmra.mrb[16].mxu0 %vm508_vm1, %v6864_v7  ;;  %v7072_v7 = vld [vmem:[%s8114_s3 + $0x40] sm:$0xff]  }
  0x67   : > { %5817 = vmatprep.mubr.msk.bf16.mxu0 %vm508_vm1, %v6922_v22  ;;  %5945 = vmatprep.subr.bf16.mxu1 %v7072_v7 }
  0x6e   : > { %5818 = vmatmul.mubr.msk.bf16.vlgmr.msra.gmra.mrb[0].mxu0 %vm508_vm1, %v6928_v38 }
  0x6f   : > { %5838 = vmatpush3.bf16.msra.mxu0 %v6592_v12  ;;  %5821 = vmatprep.mubr.msk.bf16.mxu0 %vm508_vm1, %v6935_v44 }
  0x70   : > { %5839 = vmatprep.subr.bf16.mxu0 %v6595_v14 }
  0x73   : > { %5840 = vmatpush3.bf16.msra.mxu0 %v6595_v14 }
  0x74   : > { %5841 = vmatprep.subr.bf16.mxu0 %v6598_v20 }
  0x76   : > { %5822 = vmatmul.mubr.msk.bf16.gmra.mrb[4].mxu0 %vm508_vm1, %v6944_v58 }
  0x77   : > { %5825 = vmatprep.mubr.msk.bf16.mxu0 %vm508_vm1, %v6947_v1  ;;  %5842 = vmatpush3.bf16.msra.mxu0 %v6598_v20 }
  0x78   : > { %5843 = vmatprep.subr.bf16.mxu0 %v6601_v32 }
  0x7b   : > { %5844 = vmatpush3.bf16.msra.mxu0 %v6601_v32 }
  0x7c   : > { %5865 = vmatprep.subr.bf16.mxu0 %v6603_v37 }
  0x7e   : > { %5826 = vmatmul.mubr.msk.bf16.gmra.mrb[8].mxu0 %vm508_vm1, %v6950_v5 }
  0x7f   : > { %5829 = vmatprep.mubr.msk.bf16.mxu0 %vm508_vm1, %v6960_v27 }
  0x86   : > { %5830 = vmatmul.mubr.msk.bf16.gmra.mrb[12].mxu0 %vm508_vm1, %v911_v53 }
  0x87   : > { %5833 = vmatprep.mubr.msk.bf16.mxu0 %vm508_vm1, %v920_v31 }
  0x8e   : > { %5834 = vmatmul.mubr.msk.bf16.gmra.mrb[16].mxu0 %vm508_vm1, %v929_v36 }
  0x8f   : > { %5845 = vmatprep.mubr.msk.bf16.mxu0 %vm508_vm1, %v6963_v30 }
  0x96   : > { %5846 = vmatmul.mubr.msk.bf16.vlgmr.msra.gmra.mrb[0].mxu0 %vm508_vm1, %v1131_v21 }
  0x97   : > { %5849 = vmatprep.mubr.msk.bf16.mxu0 %vm508_vm1, %v1133_v41  ;;  %5866 = vmatpush3.bf16.msra.mxu0 %v6603_v37 }
  0x98   : > { %5867 = vmatprep.subr.bf16.mxu0 %v6605_v0 }
  0x9b   : > { %5868 = vmatpush3.bf16.msra.mxu0 %v6605_v0 }
  0x9c   : > { %5885 = vmatprep.subr.bf16.mxu0 %v7078_v43 }
  0x9e   : > { %5850 = vmatmul.mubr.msk.bf16.gmra.mrb[4].mxu0 %vm508_vm1, %v1135_v60 }
  0x9f   : > { %5853 = vmatprep.mubr.msk.bf16.mxu0 %vm508_vm1, %v1137_v49 }
  0xa6   : > { %5854 = vmatmul.mubr.msk.bf16.gmra.mrb[8].mxu0 %vm508_vm1, %v1139_v59 }
  0xa7   : > { %5857 = vmatprep.mubr.msk.bf16.mxu0 %vm508_vm1, %v1141_v16 }
  0xae   : > { %5858 = vmatmul.mubr.msk.bf16.gmra.mrb[12].mxu0 %vm508_vm1, %v1143_v17 }
  0xaf   : > { %5861 = vmatprep.mubr.msk.bf16.mxu0 %vm508_vm1, %v1145_v2 }
  0xb6   : > { %5862 = vmatmul.mubr.msk.bf16.gmra.mrb[16].mxu0 %vm508_vm1, %v1147_v47 }
 0x169   : > { %v5847_v62 = vpop.f32.mrb[0].mxu0 }
 0x16a   : > { %v1344_v22 = vadd.f32 %v5847_v62, %v7084_v56  ;;  %v1236_v38 = vpop.f32.mrb[1].mxu0 }
 0x16b   : > { %v1342_v42 = vadd.f32 %v7084_v56, %v1236_v38  ;;  %v5848_v44 = vpop.f32.mrb[2].mxu0 }
 0x16c   : > { %v1345_v48 = vadd.f32 %v5848_v44, %v7084_v56  ;;  %v1239_v58 = vpop.f32.mrb[3].mxu0  ;;  %v1364_v45 = vmax.f32 %v1344_v22, 0.0 }
 0x16d   : > { %v1343_v1 = vadd.f32 %v7084_v56, %v1239_v58  ;;  %v1362_v3 = vmax.f32 %v1342_v42, 0.0  ;;  %v6610_v42 = vld [vmem:[%s8114_s3 + $0x8] sm:$0xff]  }
 0x16e   : > { %v1365_v51 = vmax.f32 %v1345_v48, 0.0 }
 0x16f   : > { %v1363_v52 = vmax.f32 %v1343_v1, 0.0 }
 0x170   : > { %v7090_v61 = vpack.c.bf16 %v1365_v51, %v1364_v45 }
 0x171   : > { %v7092_v4 = vpack.c.bf16 %v1363_v52, %v1362_v3  ;;  %v5851_v5 = vpop.f32.mrb[4].mxu0 }
 0x172   : > { %v1348_v11 = vadd.f32 %v5851_v5, %v7084_v56  ;;  %v1252_v15 = vpop.f32.mrb[5].mxu0  ;;  %v7096_v18 = vshll.u32 %v7090_v61, 16  ;;  %v7099_v19 = vshrl.u32 %v7090_v61, 16 }
 0x173   : > { %v7102_v24 = vshrl.u32 %v7092_v4, 16  ;;  %v1346_v25 = vadd.f32 %v7084_v56, %v1252_v15  ;;  %v5852_v23 = vpop.f32.mrb[6].mxu0  ;;  %v7106_v28 = vshll.u32 %v7092_v4, 16  ;;  %v6608_v15 = vld [vmem:[%s8114_s3 + $0x48] sm:$0xff]  }
 0x174   : > { %v1349_v34 = vadd.f32 %v5852_v23, %v7084_v56  ;;  %v1255_v39 = vpop.f32.mrb[7].mxu0  ;;  %v1906_v26 = vrot.slane %v7099_v19, 1  ;;  %v1368_v13 = vmax.f32 %v1348_v11, 0.0  ;;  %v1907_v35 = vrot.slane %v7096_v18, 2 }
 0x175   : > { %v1347_v27 = vadd.f32 %v7084_v56, %v1255_v39  ;;  %v1406_v30 = vrot.slane %v7106_v28, 1  ;;  %v1903_v10 = vrot.slane %v7102_v24, 1  ;;  %v1904_v31 = vrot.slane %v7106_v28, 2 }
 0x176   : > { %v1369_v53 = vmax.f32 %v1349_v34, 0.0  ;;  %v1366_v21 = vmax.f32 %v1346_v25, 0.0  ;;  %v1411_v46 = vrot.slane %v7096_v18, 1  ;;  %v1908_v40 = vor.u32 %v1907_v35, %v1906_v26 }
 0x177   : > { %v1367_v41 = vmax.f32 %v1347_v27, 0.0  ;;  %v1407_v60 = vor.u32 %v1406_v30, %v7102_v24  ;;  %v1905_v36 = vor.u32 %v1904_v31, %v1903_v10  ;;  %v7173_v27 = vld [vmem:[%s8114_s3 + $0x20] sm:$0xff]  }
 0x178   : > { %v7117_v54 = vpack.c.bf16 %v1369_v53, %v1368_v13  ;;  %v1415_v9 = vor.u32 %v7099_v19, %v1411_v46 }
 0x179   : > { %v7119_v55 = vpack.c.bf16 %v1367_v41, %v1366_v21  ;;  %v5855_v8 = vpop.f32.mrb[8].mxu0  ;;  %v1412_v57 = vsel %vm399_vm0, %v1407_v60, %v1411_v46  ;;  %v1909_v63 = vsel %vm1902_vm4, %v1905_v36, %v1908_v40 }
 0x17a   : > { %v1352_v49 = vadd.f32 %v5855_v8, %v7084_v56  ;;  %v1268_v59 = vpop.f32.mrb[9].mxu0  ;;  %5869 = vmatprep.mubr.msk.bf16.mxu0 %vm1476_vm5, %v1412_v57  ;;  %v7126_v16 = vshll.u32 %v7117_v54, 16  ;;  %v7129_v17 = vshrl.u32 %v7117_v54, 16  ;;  %5929 = vmatprep.mubr.msk.bf16.mxu1 %vm1476_vm5, %v1909_v63  ;;  %v7197_v8 = vld [vmem:[%s8114_s3 + $0x50] sm:$0xff]  }
 0x17b   : > { %v1350_v2 = vadd.f32 %v7084_v56, %v1268_v59  ;;  %v5856_v47 = vpop.f32.mrb[10].mxu0  ;;  %v7134_v29 = vshll.u32 %v7119_v55, 16  ;;  %v7137_v33 = vshrl.u32 %v7119_v55, 16 }
 0x17c   : > { %v1353_v12 = vadd.f32 %v5856_v47, %v7084_v56  ;;  %v1271_v14 = vpop.f32.mrb[11].mxu0  ;;  %v1914_v20 = vrot.slane %v7129_v17, 1  ;;  %v1372_v32 = vmax.f32 %v1352_v49, 0.0  ;;  %v1427_v62 = vrot.slane %v7126_v16, 1 }
 0x17d   : > { %v1351_v37 = vadd.f32 %v7084_v56, %v1271_v14  ;;  %v1419_v50 = vrot.slane %v7134_v29, 1  ;;  %v1910_v0 = vrot.slane %v7137_v33, 1  ;;  %v1911_v22 = vrot.slane %v7134_v29, 2 }
 0x17e   : > { %v1373_v6 = vmax.f32 %v1353_v12, 0.0  ;;  %v1915_v38 = vrot.slane %v7126_v16, 2  ;;  %v1370_v44 = vmax.f32 %v1350_v2, 0.0  ;;  %v1431_v21 = vor.u32 %v7129_v17, %v1427_v62 }
 0x17f   : > { %v1371_v48 = vmax.f32 %v1351_v37, 0.0  ;;  %v1420_v58 = vsel %vm399_vm0, %v1415_v9, %v1419_v50  ;;  %v1423_v1 = vor.u32 %v7137_v33, %v1419_v50  ;;  %v1912_v51 = vor.u32 %v1911_v22, %v1910_v0 }
 0x180   : > { %v7153_v45 = vpack.c.bf16 %v1373_v6, %v1372_v32  ;;  %5870 = vmatmul.mubr.msk.bf16.vlgmr.msra.gmra.mrb[20].mxu0 %vm1476_vm5, %v1420_v58  ;;  %v1916_v3 = vor.u32 %v1915_v38, %v1914_v20 }
 0x181   : > { %v7156_v52 = vpack.c.bf16 %v1371_v48, %v1370_v44  ;;  %v5859_v5 = vpop.f32.mrb[12].mxu0  ;;  %v1428_v11 = vsel %vm399_vm0, %v1423_v1, %v1427_v62  ;;  %5886 = vmatpush3.bf16.msra.mxu0 %v7078_v43  ;;  %v1913_v34 = vsel %vm1902_vm4, %v1908_v40, %v1912_v51 }
 0x182   : > { %v1356_v25 = vadd.f32 %v5859_v5, %v7084_v56  ;;  %v1284_v23 = vpop.f32.mrb[13].mxu0  ;;  %5873 = vmatprep.mubr.msk.bf16.mxu0 %vm1476_vm5, %v1428_v11  ;;  %v1917_v39 = vsel %vm1902_vm4, %v1912_v51, %v1916_v3  ;;  %v7168_v26 = vshll.u32 %v7153_v45, 16  ;;  %5887 = vmatprep.subr.bf16.mxu0 %v6610_v42  ;;  %v7184_v53 = vshrl.u32 %v7153_v45, 16 }
 0x183   : > { %v1354_v43 = vadd.f32 %v7084_v56, %v1284_v23  ;;  %5930 = vmatmul.mubr.msk.bf16.vlgmr.msra.gmra.mrb[0].mxu1 %vm1476_vm5, %v1913_v34  ;;  %v5860_v30 = vpop.f32.mrb[14].mxu0  ;;  %v7178_v10 = vshll.u32 %v7156_v52, 16  ;;  %v7181_v13 = vshrl.u32 %v7156_v52, 16 }
 0x184   : > { %v1357_v31 = vadd.f32 %v5860_v30, %v7084_v56  ;;  %5933 = vmatprep.mubr.msk.bf16.mxu1 %vm1476_vm5, %v1917_v39  ;;  %5946 = vmatpush3.bf16.msra.mxu1 %v7072_v7  ;;  %v1287_v35 = vpop.f32.mrb[15].mxu0  ;;  %v1923_v41 = vrot.slane %v7168_v26, 2  ;;  %v1376_v60 = vmax.f32 %v1356_v25, 0.0  ;;  %v1443_v57 = vrot.slane %v7168_v26, 1 }
 0x185   : > { %v1355_v46 = vadd.f32 %v7084_v56, %v1287_v35  ;;  %v1435_v36 = vrot.slane %v7178_v10, 1  ;;  %v1918_v40 = vrot.slane %v7181_v13, 1  ;;  %5947 = vmatprep.subr.bf16.mxu1 %v6608_v15  ;;  %5888 = vmatpush3.bf16.msra.mxu0 %v6610_v42  ;;  %v1919_v49 = vrot.slane %v7178_v10, 2 }
 0x186   : > { %v1377_v7 = vmax.f32 %v1357_v31, 0.0  ;;  %v1922_v59 = vrot.slane %v7184_v53, 1  ;;  %5905 = vmatprep.subr.bf16.mxu0 %v7173_v27  ;;  %v1374_v63 = vmax.f32 %v1354_v43, 0.0  ;;  %v1447_v5 = vor.u32 %v7184_v53, %v1443_v57 }
 0x187   : > { %v1375_v2 = vmax.f32 %v1355_v46, 0.0  ;;  %v1436_v47 = vsel %vm399_vm0, %v1431_v21, %v1435_v36  ;;  %v1439_v9 = vor.u32 %v7181_v13, %v1435_v36  ;;  %v1920_v14 = vor.u32 %v1919_v49, %v1918_v40 }
 0x188   : > { %v7205_v12 = vpack.c.bf16 %v1377_v7, %v1376_v60  ;;  %5874 = vmatmul.mubr.msk.bf16.gmra.mrb[24].mxu0 %vm1476_vm5, %v1436_v47  ;;  %v1924_v20 = vor.u32 %v1923_v41, %v1922_v59  ;;  %5948 = vmatpush3.bf16.msra.mxu1 %v6608_v15  ;;  %v2087_v59 = vrot.slane %v7102_v24, 6  ;;  %v2091_v47 = vrot.slane %v7096_v18, 7 }
 0x189   : > { %v7208_v32 = vpack.c.bf16 %v1375_v2, %v1374_v63  ;;  %v5863_v37 = vpop.f32.mrb[16].mxu0  ;;  %v1444_v50 = vsel %vm399_vm0, %v1439_v9, %v1443_v57  ;;  %5965 = vmatprep.subr.bf16.mxu1 %v7197_v8  ;;  %v1921_v62 = vsel %vm1902_vm4, %v1916_v3, %v1920_v14  ;;  %v2088_v63 = vrot.slane %v7106_v28, 7 }
 0x18a   : > { %v1360_v0 = vadd.f32 %v5863_v37, %v7084_v56  ;;  %v1300_v6 = vpop.f32.mrb[17].mxu0  ;;  %5877 = vmatprep.mubr.msk.bf16.mxu0 %vm1476_vm5, %v1444_v50  ;;  %v1925_v22 = vsel %vm1902_vm4, %v1920_v14, %v1924_v20  ;;  %v7217_v38 = vshll.u32 %v7205_v12, 16  ;;  %v7228_v1 = vshrl.u32 %v7205_v12, 16 }
 0x18b   : > { %v1358_v42 = vadd.f32 %v7084_v56, %v1300_v6  ;;  %5934 = vmatmul.mubr.msk.bf16.gmra.mrb[4].mxu1 %vm1476_vm5, %v1921_v62  ;;  %v5864_v44 = vpop.f32.mrb[18].mxu0  ;;  %v7222_v48 = vshll.u32 %v7208_v32, 16  ;;  %v7225_v58 = vshrl.u32 %v7208_v32, 16  ;;  %v2090_v2 = vrot.slane %v7099_v19, 6 }
 0x18c   : > { %v1361_v51 = vadd.f32 %v5864_v44, %v7084_v56  ;;  %5937 = vmatprep.mubr.msk.bf16.mxu1 %vm1476_vm5, %v1925_v22  ;;  %v1303_v3 = vpop.f32.mrb[19].mxu0  ;;  %v1931_v11 = vrot.slane %v7217_v38, 2  ;;  %v1380_v15 = vmax.f32 %v1360_v0, 0.0  ;;  %v1459_v43 = vrot.slane %v7217_v38, 1  ;;  %v6614_v44 = vld [vmem:[%s8114_s3 + $0x28] sm:$0xff]  }
 0x18d   : > { %v1359_v25 = vadd.f32 %v7084_v56, %v1303_v3  ;;  %v1451_v23 = vrot.slane %v7222_v48, 1  ;;  %v1926_v34 = vrot.slane %v7225_v58, 1  ;;  %v1927_v30 = vrot.slane %v7222_v48, 2 }
 0x18e   : > { %v1381_v39 = vmax.f32 %v1361_v51, 0.0  ;;  %v1930_v31 = vrot.slane %v7228_v1, 1  ;;  %v1378_v35 = vmax.f32 %v1358_v42, 0.0  ;;  %v1463_v9 = vor.u32 %v7228_v1, %v1459_v43 }
 0x18f   : > { %v1379_v21 = vmax.f32 %v1359_v25, 0.0  ;;  %v1452_v41 = vsel %vm399_vm0, %v1447_v5, %v1451_v23  ;;  %v1455_v60 = vor.u32 %v7225_v58, %v1451_v23  ;;  %v1928_v56 = vor.u32 %v1927_v30, %v1926_v34 }
 0x190   : > { %v7242_v46 = vpack.c.bf16 %v1381_v39, %v1380_v15  ;;  %5878 = vmatmul.mubr.msk.bf16.gmra.mrb[28].mxu0 %vm1476_vm5, %v1452_v41  ;;  %v1932_v36 = vor.u32 %v1931_v11, %v1930_v31  ;;  %v2089_v14 = vor.u32 %v2088_v63, %v2087_v59  ;;  %v2092_v37 = vor.u32 %v2091_v47, %v2090_v2  ;;  %v6612_v39 = vld [vmem:[%s8114_s3 + $0x58] sm:$0xff]   ;;  %v7329_v63 = vld [vmem:[%s8114_s3 + $0x60] sm:$0xff]  }
 0x191   : > { %v7245_v40 = vpack.c.bf16 %v1379_v21, %v1378_v35  ;;  %v1460_v7 = vsel %vm399_vm0, %v1455_v60, %v1459_v43  ;;  %v1929_v57 = vsel %vm1902_vm4, %v1924_v20, %v1928_v56  ;;  %v2094_v20 = vrot.slane %v7137_v33, 6 }
 0x192   : > { %5881 = vmatprep.mubr.msk.bf16.mxu0 %vm1476_vm5, %v1460_v7  ;;  %v1933_v49 = vsel %vm1902_vm4, %v1928_v56, %v1932_v36  ;;  %v2095_v50 = vrot.slane %v7134_v29, 7  ;;  %v2098_v28 = vrot.slane %v7129_v17, 6  ;;  %v2099_v0 = vrot.slane %v7126_v16, 7 }
 0x193   : > { %5938 = vmatmul.mubr.msk.bf16.gmra.mrb[8].mxu1 %vm1476_vm5, %v1929_v57  ;;  %v2093_v6 = vsel %vm2086_vm6, %v2089_v14, %v2092_v37  ;;  %v7269_v22 = vshrl.u32 %v7245_v40, 16  ;;  %v2451_v51 = vrot.slane %v7102_v24, 7  ;;  %v8120_v3 = vrot.slane %v7099_v19, 7 }
 0x194   : > { %5941 = vmatprep.mubr.msk.bf16.mxu1 %vm1476_vm5, %v1933_v49  ;;  %v2096_v62 = vor.u32 %v2095_v50, %v2094_v20  ;;  %v2100_v42 = vor.u32 %v2099_v0, %v2098_v28  ;;  %v2102_v11 = vrot.slane %v7181_v13, 6  ;;  %v2461_v15 = vrot.slane %v7181_v13, 7 }
 0x195   : > { %v2103_v25 = vrot.slane %v7178_v10, 7  ;;  %v2453_v23 = vor.u32 %v8120_v3, %v7096_v18  ;;  %v2464_v24 = vrot.slane %v7184_v53, 7  ;;  %v2467_v34 = vrot.slane %v7225_v58, 7 }
 0x196   : > { %v7277_v5 = vsel %vm2086_vm6, %v2092_v37, %v2096_v62  ;;  %v7296_v43 = vshll.u32 %v7245_v40, 16  ;;  %v7299_v30 = vor.u32 %v2461_v15, %v7178_v10  ;;  %v2470_v31 = vrot.slane %v7228_v1, 7 }
 0x197   : > { %v2473_v35 = vrot.slane %v7269_v22, 7  ;;  %v7304_v21 = vsel %vm2086_vm6, %v2096_v62, %v2100_v42  ;;  %v7307_v41 = vsel %vm2450_vm7, %v2451_v51, %v2453_v23  ;;  %v2465_v60 = vor.u32 %v2464_v24, %v7168_v26 }
 0x198   : > { %5882 = vmatmul.mubr.msk.bf16.gmra.mrb[32].mxu0 %vm1476_vm5, %v1463_v9  ;;  %v2106_v56 = vrot.slane %v7184_v53, 6  ;;  %v2471_v7 = vor.u32 %v2470_v31, %v7217_v38  ;;  %v2927_v14 = vrot.slane %v7099_v19, 5  ;;  %v2928_v37 = vrot.slane %v7096_v18, 6 }
 0x199   : > { %5889 = vmatprep.mubr.msk.bf16.mxu0 %vm1476_vm5, %v7092_v4  ;;  %v2474_v57 = vor.u32 %v2473_v35, %v7296_v43  ;;  %v7321_v49 = vsel %vm2450_vm7, %v2461_v15, %v2465_v60  ;;  %v2110_v20 = vrot.slane %v7225_v58, 6  ;;  %v2111_v50 = vrot.slane %v7222_v48, 7 }
 0x19a   : > { %v7332_v2 = vsel %vm2450_vm7, %v2467_v34, %v2471_v7  ;;  %v2114_v28 = vrot.slane %v7228_v1, 6  ;;  %v2115_v0 = vrot.slane %v7217_v38, 7  ;;  %v7351_v62 = vor.u32 %v2928_v37, %v2927_v14 }
 0x19b   : > { %5942 = vmatmul.mubr.msk.bf16.gmra.mrb[12].mxu1 %vm1476_vm5, %v1932_v36  ;;  %v2107_v36 = vrot.slane %v7168_v26, 7  ;;  %v7335_v47 = vsel %vm2450_vm7, %v2470_v31, %v2474_v57  ;;  %v2938_v18 = vrot.slane %v7181_v13, 5  ;;  %v2943_v15 = vrot.slane %v7168_v26, 6 }
 0x19c   : > { %5949 = vmatprep.mubr.msk.bf16.mxu1 %vm1476_vm5, %v2093_v6  ;;  %v2947_v23 = vrot.slane %v7222_v48, 6  ;;  %v2954_v31 = vrot.slane %v7269_v22, 5  ;;  %v2112_v35 = vor.u32 %v2111_v50, %v2110_v20  ;;  %v1735_v14 = vrot.slane %v7092_v4, 1 }
 0x19d   : > { %v2108_v9 = vor.u32 %v2107_v36, %v2106_v56  ;;  %v2116_v56 = vor.u32 %v2115_v0, %v2114_v28  ;;  %v1736_v37 = vrot.slane %v7090_v61, 1  ;;  %v2121_v28 = vrot.slane %v7269_v22, 6 }
 0x19e   : > { %v2124_v0 = vrot.slane %v7296_v43, 7  ;;  %vm4147_vm0 = vcmask 957440   ;;  %vm6683_vm4 = vmmov 0  }
 0x19f   : > { %v7391_v50 = vsel %vm2086_vm6, %v2108_v9, %v2112_v35 }
 0x1a0   : > { %5890 = vmatmul.mubr.msk.bf16.vlgmr.msra.gmra.mrb[20].mxu0 %vm1476_vm5, %v7090_v61  ;;  %8128 = vst [vmem:[#allocation4_spill] sm:$0xff] %v7391_v50 }
 0x1a1   : > { %5893 = vmatprep.mubr.msk.bf16.mxu0 %vm1476_vm5, %v7119_v55  ;;  %5906 = vmatpush3.bf16.msra.mxu0 %v7173_v27  ;;  %v2468_v27 = vor.u32 %v2467_v34, %v7222_v48 }
 0x1a2   : > { %5907 = vmatprep.subr.bf16.mxu0 %v6614_v44 }
 0x1a3   : > { %5950 = vmatmul.mubr.msk.bf16.vlgmr.msra.gmra.mrb[0].mxu1 %vm1476_vm5, %v7277_v5  ;;  %v7324_v59 = vsel %vm2450_vm7, %v2464_v24, %v2468_v27  ;;  %v2950_v24 = vrot.slane %v7228_v1, 5  ;;  %v2955_v27 = vrot.slane %v7296_v43, 6 }
 0x1a4   : > { %5953 = vmatprep.mubr.msk.bf16.mxu1 %vm1476_vm5, %v7304_v21  ;;  %5966 = vmatpush3.bf16.msra.mxu1 %v7197_v8  ;;  %v2104_v8 = vor.u32 %v2103_v25, %v2102_v11  ;;  %v2942_v11 = vrot.slane %v7184_v53, 5  ;;  %v2946_v25 = vrot.slane %v7225_v58, 5 }
 0x1a5   : > { %5967 = vmatprep.subr.bf16.mxu1 %v6612_v39  ;;  %5908 = vmatpush3.bf16.msra.mxu0 %v6614_v44  ;;  %v2939_v44 = vrot.slane %v7178_v10, 6 }
 0x1a6   : > { %v7349_v6 = vsel %vm2086_vm6, %v2100_v42, %v2104_v8  ;;  %v7358_v51 = vsel %vm2086_vm6, %v2104_v8, %v2108_v9  ;;  %v2944_v34 = vor.u32 %v2943_v15, %v2942_v11  ;;  %v2948_v60 = vor.u32 %v2947_v23, %v2946_v25 }
 0x1a7   : > { %8126 = vst [vmem:[#allocation2_spill] sm:$0xff] %v7349_v6  ;;  %8127 = vst [vmem:[#allocation3_spill] sm:$0xff] %v7358_v51  ;;  %v7365_v42 = vor.u32 %v2939_v44, %v2938_v18  ;;  %v7381_v8 = vor.u32 %v2955_v27, %v2954_v31  ;;  %v7402_v44 = vsel %vm2086_vm6, %v2112_v35, %v2116_v56  ;;  %v7407_v9 = vshrl.u32 %v7242_v46, 16 }
 0x1a8   : > { %5894 = vmatmul.mubr.msk.bf16.gmra.mrb[24].mxu0 %vm1476_vm5, %v7117_v54  ;;  %5968 = vmatpush3.bf16.msra.mxu1 %v6612_v39  ;;  %v2951_v39 = vrot.slane %v7217_v38, 6  ;;  %v7379_v57 = vsel %vm2926_vm8, %v2944_v34, %v2948_v60  ;;  %8129 = vst [vmem:[#allocation5_spill] sm:$0xff] %v7402_v44  ;;  %v7410_v11 = vshll.u32 %v7242_v46, 16  ;;  %v1737_v15 = vsel %vm1734_vm9, %v1735_v14, %v1736_v37 }
 0x1a9   : > { %5897 = vmatprep.mubr.msk.bf16.mxu0 %vm1476_vm5, %v7156_v52  ;;  %5985 = vmatprep.subr.bf16.mxu1 %v7329_v63  ;;  %v7374_v36 = vsel %vm2926_vm8, %v7365_v42, %v2944_v34  ;;  %v2281_v25 = vrot.slane %v7092_v4, 7  ;;  %v2125_v23 = vor.u32 %v2124_v0, %v2121_v28  ;;  %v2282_v31 = vrot.slane %v7090_v61, 7 }
 0x1aa   : > { %v2952_v7 = vor.u32 %v2951_v39, %v2950_v24  ;;  %v3284_v24 = vrot.slane %v7407_v9, 6  ;;  %v3287_v34 = vrot.slane %v7410_v11, 7  ;;  %v3429_v39 = vrot.slane %v7181_v13, 3 }
 0x1ab   : > { %5954 = vmatmul.mubr.msk.bf16.gmra.mrb[4].mxu1 %vm1476_vm5, %v7349_v6  ;;  %v3430_v35 = vrot.slane %v7178_v10, 4  ;;  %v3434_v27 = vrot.slane %v7168_v26, 4  ;;  %v1738_v4 = vrot.slane %v7119_v55, 1  ;;  %v3437_v14 = vrot.slane %v7225_v58, 3 }
 0x1ac   : > { %5957 = vmatprep.mubr.msk.bf16.mxu1 %vm1476_vm5, %v7358_v51  ;;  %v7388_v20 = vsel %vm2926_vm8, %v2948_v60, %v2952_v7  ;;  %v7397_v18 = vsel %vm2926_vm8, %v2952_v7, %v7381_v8  ;;  %v3433_v60 = vrot.slane %v7184_v53, 3  ;;  %v3288_v7 = vor.u32 %v3287_v34, %v3284_v24 }
 0x1ad   : > { %v3438_v28 = vrot.slane %v7222_v48, 4  ;;  %v7427_v0 = vor.u32 %v3430_v35, %v3429_v39  ;;  %v7432_v51 = vsel %vm2086_vm6, %v2116_v56, %v2125_v23  ;;  %v3445_v34 = vrot.slane %v7269_v22, 3 }
 0x1ae   : > { %v3435_v3 = vor.u32 %v3434_v27, %v3433_v60  ;;  %v7435_v6 = vsel %vm2086_vm6, %v2125_v23, %v3288_v7  ;;  %v3446_v60 = vrot.slane %v7296_v43, 4  ;;  %v1740_v56 = vrot.slane %v7117_v54, 1 }
 0x1af   : > { %v3439_v24 = vor.u32 %v3438_v28, %v3437_v14  ;;  %v3449_v27 = vrot.slane %v7407_v9, 3  ;;  %v3450_v7 = vrot.slane %v7410_v11, 4  ;;  %v2284_v28 = vrot.slane %v7119_v55, 7 }
 0x1b0   : > { %5898 = vmatmul.mubr.msk.bf16.gmra.mrb[28].mxu0 %vm1476_vm5, %v7153_v45  ;;  %v7443_v39 = vsel %vm3421_vm11, %v7427_v0, %v3435_v3  ;;  %v3447_v14 = vor.u32 %v3446_v60, %v3445_v34  ;;  %v6616_v34 = vld [vmem:[%s8114_s3 + $0x68] sm:$0xff]   ;;  %v3781_v60 = vrot.slane %v7181_v13, 4  ;;  %v3790_v13 = vrot.slane %v7222_v48, 5 }
 0x1b1   : > { %5901 = vmatprep.mubr.msk.bf16.mxu0 %vm1476_vm5, %v7208_v32  ;;  %8130 = vst [vmem:[#allocation6_spill] sm:$0xff] %v7443_v39  ;;  %v7449_v23 = vsel %vm3421_vm11, %v3435_v3, %v3439_v24  ;;  %v1741_v3 = vsel %vm1734_vm9, %v1738_v4, %v1740_v56 }
 0x1b3   : > { %5958 = vmatmul.mubr.msk.bf16.gmra.mrb[8].mxu1 %vm1476_vm5, %v7391_v50  ;;  %v3442_v50 = vrot.slane %v7217_v38, 4 }
 0x1b4   : > { %5961 = vmatprep.mubr.msk.bf16.mxu1 %vm1476_vm5, %v7402_v44  ;;  %v3441_v44 = vrot.slane %v7228_v1, 3 }
 0x1b6   : > { %v3443_v35 = vor.u32 %v3442_v50, %v3441_v44  ;;  %v7457_v50 = vor.u32 %v3450_v7, %v3449_v27  ;;  %v1739_v44 = vsel %vm1734_vm9, %v1736_v37, %v1738_v4  ;;  %v2285_v37 = vsel %vm2280_vm10, %v2282_v31, %v2284_v28 }
 0x1b7   : > { %v3782_v27 = vrot.slane %v7178_v10, 5  ;;  %v1744_v7 = vrot.slane %v7153_v45, 1  ;;  %v3789_v10 = vrot.slane %v7225_v58, 4  ;;  %v3798_v58 = vrot.slane %v7296_v43, 5 }
 0x1b8   : > { %5902 = vmatmul.mubr.msk.bf16.gmra.mrb[36].mxu0 %vm1476_vm5, %v7205_v12  ;;  %8131 = vst [vmem:[#allocation7_spill] sm:$0xff] %v7457_v50  ;;  %v7462_v39 = vsel %vm3421_vm11, %v3443_v35, %v3447_v14 }
 0x1b9   : > { %5909 = vmatprep.mubr.msk.bf16.mxu0 %vm1476_vm5, %v1737_v15  ;;  %v2283_v15 = vsel %vm2280_vm10, %v2281_v25, %v2282_v31  ;;  %v7454_v25 = vsel %vm3421_vm11, %v3439_v24, %v3443_v35  ;;  %v7468_v24 = vsel %vm3421_vm11, %v3447_v14, %v7457_v50  ;;  %v1742_v35 = vrot.slane %v7156_v52, 1 }
 0x1ba   : > { %v3785_v14 = vrot.slane %v7184_v53, 4  ;;  %v2288_v31 = vrot.slane %v7156_v52, 7 }
 0x1bb   : > { %5962 = vmatmul.mubr.msk.bf16.gmra.mrb[16].mxu1 %vm1476_vm5, %v7432_v51 }
 0x1bc   : > { %5969 = vmatprep.mubr.msk.bf16.mxu1 %vm1476_vm5, %v2283_v15  ;;  %v2286_v15 = vrot.slane %v7117_v54, 7 }
 0x1be   : > { %v2287_v4 = vsel %vm2280_vm10, %v2284_v28, %v2286_v15  ;;  %v6617_v28 = vld [vmem:[%s8114_s3 + $0x70] sm:$0xff]  }
 0x1c0   : > { %5910 = vmatmul.mubr.msk.bf16.vlgmr.msra.gmra.mrb[20].mxu0 %vm1476_vm5, %v1739_v44  ;;  %v3786_v44 = vrot.slane %v7168_v26, 5  ;;  %v3793_v26 = vrot.slane %v7228_v1, 4  ;;  %v3802_v1 = vrot.slane %v7410_v11, 5 }
 0x1c1   : > { %5913 = vmatprep.mubr.msk.bf16.mxu0 %vm1476_vm5, %v1741_v3  ;;  %v7486_v3 = vor.u32 %v3782_v27, %v3781_v60  ;;  %v2290_v60 = vrot.slane %v7153_v45, 7  ;;  %v3791_v27 = vor.u32 %v3790_v13, %v3789_v10  ;;  %v1748_v13 = vrot.slane %v7205_v12, 1 }
 0x1c2   : > { %v3787_v53 = vor.u32 %v3786_v44, %v3785_v14  ;;  %v3801_v14 = vrot.slane %v7407_v9, 4  ;;  %v2289_v9 = vsel %vm2280_vm10, %v2286_v15, %v2288_v31 }
 0x1c3   : > { %5970 = vmatmul.mubr.msk.bf16.vlgmr.msra.gmra.mrb[0].mxu1 %vm1476_vm5, %v2285_v37  ;;  %v3794_v37 = vrot.slane %v7217_v38, 5  ;;  %v1745_v38 = vsel %vm1734_vm9, %v1742_v35, %v1744_v7 }
 0x1c4   : > { %5973 = vmatprep.mubr.msk.bf16.mxu1 %vm1476_vm5, %v2287_v4  ;;  %5986 = vmatpush3.bf16.msra.mxu1 %v7329_v63  ;;  %v3797_v63 = vrot.slane %v7269_v22, 4  ;;  %v1743_v4 = vsel %vm1734_vm9, %v1740_v56, %v1742_v35  ;;  %v7501_v48 = vsel %vm3773_vm12, %v7486_v3, %v3787_v53  ;;  %v7508_v22 = vsel %vm3773_vm12, %v3787_v53, %v3791_v27 }
 0x1c5   : > { %5987 = vmatprep.subr.bf16.mxu1 %v6616_v34  ;;  %v3795_v50 = vor.u32 %v3794_v37, %v3793_v26  ;;  %v7514_v44 = vor.u32 %v3802_v1, %v3801_v14  ;;  %v1746_v35 = vrot.slane %v7208_v32, 1  ;;  %v2292_v53 = vrot.slane %v7208_v32, 7  ;;  %v6618_v14 = vld [vmem:[%s8114_s3 + $0x78] sm:$0xff]  }
 0x1c6   : > { %v3799_v56 = vor.u32 %v3798_v58, %v3797_v63  ;;  %v2296_v63 = vrot.slane %v7245_v40, 7  ;;  %v8132_v1 = vrot.slane %v7099_v19, 7  ;;  %v6620_v19 = vld [vmem:[%s8114_s3 + $0x88] sm:$0xff]  }
 0x1c7   : > { %v7512_v43 = vsel %vm3773_vm12, %v3791_v27, %v3795_v50  ;;  %v1747_v15 = vsel %vm1734_vm9, %v1744_v7, %v1746_v35  ;;  %v2293_v26 = vsel %vm2280_vm10, %v2290_v60, %v2292_v53  ;;  %v2458_v27 = vrot.slane %v7129_v17, 7 }
 0x1c8   : > { %5914 = vmatmul.mubr.msk.bf16.gmra.mrb[24].mxu0 %vm1476_vm5, %v1743_v4  ;;  %5988 = vmatpush3.bf16.msra.mxu1 %v6616_v34  ;;  %v7518_v11 = vsel %vm3773_vm12, %v3795_v50, %v3799_v56  ;;  %v2291_v34 = vsel %vm2280_vm10, %v2288_v31, %v2290_v60  ;;  %v7525_v10 = vsel %vm3773_vm12, %v3799_v56, %v7514_v44  ;;  %v2294_v50 = vrot.slane %v7205_v12, 7 }
 0x1c9   : > { %5917 = vmatprep.mubr.msk.bf16.mxu0 %vm1476_vm5, %v1745_v38  ;;  %6005 = vmatprep.subr.bf16.mxu1 %v6617_v28  ;;  %v1749_v31 = vsel %vm1734_vm9, %v1746_v35, %v1748_v13  ;;  %v2455_v4 = vrot.slane %v7137_v33, 7  ;;  %v2459_v58 = vor.u32 %v2458_v27, %v7126_v16 }
 0x1ca   : > { %v2295_v37 = vsel %vm2280_vm10, %v2292_v53, %v2294_v50  ;;  %v2297_v7 = vsel %vm2280_vm10, %v2294_v50, %v2296_v63  ;;  %v6623_v53 = vld [vmem:[%s8114_s3 + $0xa0] sm:$0xff]   ;;  %v2768_v50 = vrot.slane %v7208_v32, 5  ;;  %v7630_v63 = vrot.slane %v7245_v40, 5 }
 0x1cb   : > { %5974 = vmatmul.mubr.msk.bf16.gmra.mrb[4].mxu1 %vm1476_vm5, %v2289_v9  ;;  %v2456_v60 = vor.u32 %v2455_v4, %v7134_v29  ;;  %v2460_v56 = vsel %vm2450_vm7, %v2455_v4, %v2459_v58  ;;  %v2463_v9 = vsel %vm2450_vm7, %v2458_v27, %v7299_v30  ;;  %v6621_v30 = vld [vmem:[%s8114_s3 + $0x90] sm:$0xff]   ;;  %v2930_v27 = vrot.slane %v7137_v33, 5 }
 0x1cc   : > { %5977 = vmatprep.mubr.msk.bf16.mxu1 %vm1476_vm5, %v2291_v34  ;;  %v6622_v34 = vld [vmem:[%s8114_s3 + $0x98] sm:$0xff]  }
 0x1cd   : > { %v2457_v38 = vsel %vm2450_vm7, %v8132_v1, %v2456_v60  ;;  %v2931_v60 = vrot.slane %v7134_v29, 6  ;;  %v2935_v1 = vrot.slane %v7126_v16, 6 }
 0x1cf   : > { %v2932_v58 = vor.u32 %v2931_v60, %v2930_v27  ;;  %v3123_v27 = vrot.slane %v7205_v12, 6 }
 0x1d0   : > { %5918 = vmatmul.mubr.msk.bf16.gmra.mrb[28].mxu0 %vm1476_vm5, %v1747_v15  ;;  %v2766_v15 = vrot.slane %v7153_v45, 5 }
 0x1d1   : > { %5921 = vmatprep.mubr.msk.bf16.mxu0 %vm1476_vm5, %v1749_v31 }
 0x1d3   : > { %5978 = vmatmul.mubr.msk.bf16.gmra.mrb[8].mxu1 %vm1476_vm5, %v2293_v26  ;;  %v7624_v26 = vsel %vm2758_vm13, %v2766_v15, %v2768_v50 }
 0x1d4   : > { %5981 = vmatprep.mubr.msk.bf16.mxu1 %vm1476_vm5, %v2295_v37  ;;  %v2770_v37 = vrot.slane %v7205_v12, 5 }
 0x1d6   : > { %v7639_v4 = vsel %vm2758_vm13, %v2770_v37, %v7630_v63 }
 0x1d8   : > { %5922 = vmatmul.mubr.msk.bf16.gmra.mrb[40].mxu0 %vm1476_vm5, %v1748_v13 }
 0x1db   : > { %5982 = vmatmul.mubr.msk.bf16.gmra.mrb[20].mxu1 %vm1476_vm5, %v2297_v7  ;;  %v7633_v7 = vsel %vm2758_vm13, %v2768_v50, %v2770_v37 }
 0x1dc   : > { %5989 = vmatprep.mubr.msk.bf16.mxu1 %vm1476_vm5, %v7307_v41  ;;  %v6619_v41 = vld [vmem:[%s8114_s3 + $0x80] sm:$0xff]  }
 0x1e3   : > { %5990 = vmatmul.mubr.msk.bf16.vlgmr.msra.gmra.mrb[0].mxu1 %vm1476_vm5, %v2457_v38  ;;  %v2933_v38 = vsel %vm2926_vm8, %v7351_v62, %v2932_v58  ;;  %v6625_v62 = vld [vmem:[%s8114_s3 + $0xb0] sm:$0xff]  }
 0x1e4   : > { %5993 = vmatprep.mubr.msk.bf16.mxu1 %vm1476_vm5, %v2460_v56  ;;  %6006 = vmatpush3.bf16.msra.mxu1 %v6617_v28  ;;  %v2764_v28 = vrot.slane %v7156_v52, 5 }
 0x1e5   : > { %6007 = vmatprep.subr.bf16.mxu1 %v6618_v14 }
 0x1e6   : > { %v7619_v31 = vsel %vm2758_vm13, %v2764_v28, %v2766_v15 }
 0x1e8   : > { %6008 = vmatpush3.bf16.msra.mxu1 %v6618_v14  ;;  %v2934_v14 = vrot.slane %v7129_v17, 5 }
 0x1e9   : > { %6025 = vmatprep.subr.bf16.mxu1 %v6619_v41 }
 0x1ea   : > { %v2936_v56 = vor.u32 %v2935_v1, %v2934_v14 }
 0x1eb   : > { %5994 = vmatmul.mubr.msk.bf16.gmra.mrb[4].mxu1 %vm1476_vm5, %v2463_v9 }
 0x1ec   : > { %5997 = vmatprep.mubr.msk.bf16.mxu1 %vm1476_vm5, %v7321_v49  ;;  %v2760_v49 = vrot.slane %v7119_v55, 5  ;;  %v2937_v9 = vsel %vm2926_vm8, %v2932_v58, %v2936_v56  ;;  %v3125_v58 = vrot.slane %v7245_v40, 6 }
 0x1f3   : > { %5998 = vmatmul.mubr.msk.bf16.gmra.mrb[8].mxu1 %vm1476_vm5, %v7324_v59  ;;  %v2759_v59 = vrot.slane %v7090_v61, 5 }
 0x1f4   : > { %6001 = vmatprep.mubr.msk.bf16.mxu1 %vm1476_vm5, %v7332_v2 }
 0x1f5   : > { %v2761_v2 = vsel %vm2758_vm13, %v2759_v59, %v2760_v49  ;;  %v3119_v59 = vrot.slane %v7153_v45, 6 }
 0x1fb   : > { %6002 = vmatmul.mubr.msk.bf16.gmra.mrb[24].mxu1 %vm1476_vm5, %v7335_v47  ;;  %v2762_v47 = vrot.slane %v7117_v54, 5 }
 0x1fc   : > { %6009 = vmatprep.mubr.msk.bf16.mxu1 %vm1476_vm5, %v7090_v61 }
 0x1fd   : > { %v7604_v35 = vsel %vm2758_vm13, %v2760_v49, %v2762_v47  ;;  %v7609_v13 = vsel %vm2758_vm13, %v2762_v47, %v2764_v28 }
 0x203   : > { %6010 = vmatmul.mubr.msk.bf16.vlgmr.msra.gmra.mrb[0].mxu1 %vm1476_vm5, %v7119_v55 }
 0x204   : > { %6013 = vmatprep.mubr.msk.bf16.mxu1 %vm1476_vm5, %v7117_v54  ;;  %6026 = vmatpush3.bf16.msra.mxu1 %v6619_v41  ;;  %v6624_v41 = vld [vmem:[%s8114_s3 + $0xa8] sm:$0xff]  }
 0x205   : > { %6027 = vmatprep.subr.bf16.mxu1 %v6620_v19 }
 0x208   : > { %6028 = vmatpush3.bf16.msra.mxu1 %v6620_v19  ;;  %v2941_v19 = vsel %vm2926_vm8, %v2936_v56, %v7365_v42  ;;  %v3113_v42 = vrot.slane %v7119_v55, 6  ;;  %v3126_v56 = vsel %vm3111_vm14, %v3123_v27, %v3125_v58 }
 0x209   : > { %6045 = vmatprep.subr.bf16.mxu1 %v6621_v30 }
 0x20b   : > { %6014 = vmatmul.mubr.msk.bf16.gmra.mrb[4].mxu1 %vm1476_vm5, %v7156_v52 }
 0x20c   : > { %6017 = vmatprep.mubr.msk.bf16.mxu1 %vm1476_vm5, %v7153_v45 }
 0x213   : > { %6018 = vmatmul.mubr.msk.bf16.gmra.mrb[8].mxu1 %vm1476_vm5, %v7208_v32 }
 0x214   : > { %6021 = vmatprep.mubr.msk.bf16.mxu1 %vm1476_vm5, %v7205_v12 }
 0x21b   : > { %6022 = vmatmul.mubr.msk.bf16.gmra.mrb[28].mxu1 %vm1476_vm5, %v7245_v40 }
 0x21c   : > { %6029 = vmatprep.mubr.msk.bf16.mxu1 %vm1476_vm5, %v2761_v2  ;;  %v3121_v2 = vrot.slane %v7208_v32, 6 }
 0x223   : > { %6030 = vmatmul.mubr.msk.bf16.vlgmr.msra.gmra.mrb[0].mxu1 %vm1476_vm5, %v7604_v35 }
 0x224   : > { %6033 = vmatprep.mubr.msk.bf16.mxu1 %vm1476_vm5, %v7609_v13  ;;  %6046 = vmatpush3.bf16.msra.mxu1 %v6621_v30  ;;  %v3112_v30 = vrot.slane %v7090_v61, 6 }
 0x225   : > { %6047 = vmatprep.subr.bf16.mxu1 %v6622_v34 }
 0x226   : > { %v3114_v49 = vsel %vm3111_vm14, %v3112_v30, %v3113_v42  ;;  %v8134_v30 = vld [vmem:[#allocation3_spill] sm:$0xff] }
 0x228   : > { %6048 = vmatpush3.bf16.msra.mxu1 %v6622_v34  ;;  %v3122_v34 = vsel %vm3111_vm14, %v3119_v59, %v3121_v2 }
 0x229   : > { %6065 = vmatprep.subr.bf16.mxu1 %v6623_v53 }
 0x22b   : > { %6034 = vmatmul.mubr.msk.bf16.gmra.mrb[4].mxu1 %vm1476_vm5, %v7619_v31 }
 0x22c   : > { %6037 = vmatprep.mubr.msk.bf16.mxu1 %vm1476_vm5, %v7624_v26 }
 0x233   : > { %6038 = vmatmul.mubr.msk.bf16.gmra.mrb[8].mxu1 %vm1476_vm5, %v7633_v7 }
 0x234   : > { %6041 = vmatprep.mubr.msk.bf16.mxu1 %vm1476_vm5, %v7639_v4 }
 0x23b   : > { %6042 = vmatmul.mubr.msk.bf16.gmra.mrb[32].mxu1 %vm1476_vm5, %v7630_v63 }
 0x23c   : > { %6049 = vmatprep.mubr.msk.bf16.mxu1 %vm1476_vm5, %v2933_v38  ;;  %v3124_v38 = vsel %vm3111_vm14, %v3121_v2, %v3123_v27  ;;  %v3422_v27 = vrot.slane %v7137_v33, 3 }
 0x243   : > { %6050 = vmatmul.mubr.msk.bf16.vlgmr.msra.gmra.mrb[0].mxu1 %vm1476_vm5, %v2937_v9 }
 0x244   : > { %6053 = vmatprep.mubr.msk.bf16.mxu1 %vm1476_vm5, %v2941_v19  ;;  %6066 = vmatpush3.bf16.msra.mxu1 %v6623_v53  ;;  %v6628_v19 = vld [vmem:[%s8114_s3 + $0xc8] sm:$0xff]  }
 0x245   : > { %6067 = vmatprep.subr.bf16.mxu1 %v6624_v41 }
 0x248   : > { %6068 = vmatpush3.bf16.msra.mxu1 %v6624_v41  ;;  %v3127_v41 = vrot.slane %v7242_v46, 6 }
 0x249   : > { %6085 = vmatprep.subr.bf16.mxu1 %v6625_v62 }
 0x24a   : > { %v3128_v9 = vsel %vm3111_vm14, %v3125_v58, %v3127_v41  ;;  %v3425_v58 = vrot.slane %v7129_v17, 3 }
 0x24b   : > { %6054 = vmatmul.mubr.msk.bf16.gmra.mrb[4].mxu1 %vm1476_vm5, %v7374_v36  ;;  %v3115_v36 = vrot.slane %v7117_v54, 6 }
 0x24c   : > { %6057 = vmatprep.mubr.msk.bf16.mxu1 %vm1476_vm5, %v7379_v57  ;;  %v3117_v57 = vrot.slane %v7156_v52, 6 }
 0x24e   : > { %v3118_v61 = vsel %vm3111_vm14, %v3115_v36, %v3117_v57  ;;  %v3120_v47 = vsel %vm3111_vm14, %v3117_v57, %v3119_v59 }
 0x253   : > { %6058 = vmatmul.mubr.msk.bf16.gmra.mrb[8].mxu1 %vm1476_vm5, %v7388_v20  ;;  %v6626_v20 = vld [vmem:[%s8114_s3 + $0xb8] sm:$0xff]  }
 0x254   : > { %6061 = vmatprep.mubr.msk.bf16.mxu1 %vm1476_vm5, %v7397_v18  ;;  %v3116_v18 = vsel %vm3111_vm14, %v3113_v42, %v3115_v36  ;;  %v6629_v42 = vld [vmem:[%s8114_s3 + $0xd0] sm:$0xff]  }
 0x255   : > { %v8135_v36 = vld [vmem:[#allocation4_spill] sm:$0xff] }
 0x25b   : > { %6062 = vmatmul.mubr.msk.bf16.gmra.mrb[36].mxu1 %vm1476_vm5, %v7381_v8  ;;  %v6627_v8 = vld [vmem:[%s8114_s3 + $0xc0] sm:$0xff]  }
 0x25c   : > { %6069 = vmatprep.mubr.msk.bf16.mxu1 %vm1476_vm5, %v3114_v49 }
 0x263   : > { %6070 = vmatmul.mubr.msk.bf16.vlgmr.msra.gmra.mrb[0].mxu1 %vm1476_vm5, %v3116_v18 }
 0x264   : > { %6073 = vmatprep.mubr.msk.bf16.mxu1 %vm1476_vm5, %v3118_v61  ;;  %6086 = vmatpush3.bf16.msra.mxu1 %v6625_v62  ;;  %v8133_v62 = vld [vmem:[#allocation2_spill] sm:$0xff] }
 0x265   : > { %6087 = vmatprep.subr.bf16.mxu1 %v6626_v20 }
 0x268   : > { %6088 = vmatpush3.bf16.msra.mxu1 %v6626_v20 }
 0x269   : > { %6105 = vmatprep.subr.bf16.mxu1 %v6627_v8 }
 0x26b   : > { %6074 = vmatmul.mubr.msk.bf16.gmra.mrb[4].mxu1 %vm1476_vm5, %v3120_v47  ;;  %v5883_v28 = vpop.f32.mrb[32].mxu0 }
 0x26c   : > { %6077 = vmatprep.mubr.msk.bf16.mxu1 %vm1476_vm5, %v3122_v34  ;;  %v1583_v53 = vpop.f32.mrb[33].mxu0  ;;  %v8136_v34 = vld [vmem:[#allocation5_spill] sm:$0xff] }
 0x26d   : > { %v5884_v15 = vpop.f32.mrb[34].mxu0 }
 0x26e   : > { %v7695_v50 = vpop.f32.mrb[12].mxu1  ;;  %v1586_v37 = vpop.f32.mrb[35].mxu0 }
 0x26f   : > { %v7698_v60 = vpop.f32.mrb[13].mxu1 }
 0x270   : > { %v5944_v14 = vpop.f32.mrb[14].mxu1 }
 0x271   : > { %v7701_v1 = vpop.f32.mrb[15].mxu1 }
 0x273   : > { %6078 = vmatmul.mubr.msk.bf16.gmra.mrb[8].mxu1 %vm1476_vm5, %v3124_v38 }
 0x274   : > { %6081 = vmatprep.mubr.msk.bf16.mxu1 %vm1476_vm5, %v3126_v56 }
 0x27b   : > { %6082 = vmatmul.mubr.msk.bf16.gmra.mrb[40].mxu1 %vm1476_vm5, %v3128_v9 }
 0x27c   : > { %6089 = vmatprep.mubr.msk.bf16.mxu1 %vm1476_vm5, %v7277_v5 }
 0x283   : > { %6090 = vmatmul.mubr.msk.bf16.vlgmr.msra.gmra.mrb[0].mxu1 %vm1476_vm5, %v7304_v21 }
 0x284   : > { %6093 = vmatprep.mubr.msk.bf16.mxu1 %vm1476_vm5, %v8133_v62  ;;  %6106 = vmatpush3.bf16.msra.mxu1 %v6627_v8 }
 0x285   : > { %6107 = vmatprep.subr.bf16.mxu1 %v6628_v19 }
 0x288   : > { %6108 = vmatpush3.bf16.msra.mxu1 %v6628_v19 }
 0x289   : > { %6125 = vmatprep.subr.bf16.mxu1 %v6629_v42 }
 0x28b   : > { %6094 = vmatmul.mubr.msk.bf16.gmra.mrb[4].mxu1 %vm1476_vm5, %v8134_v30  ;;  %v5903_v5 = vpop.f32.mrb[36].mxu0 }
 0x28c   : > { %v1716_v49 = vadd.f32 %v5903_v5, %v5883_v28  ;;  %6097 = vmatprep.mubr.msk.bf16.mxu1 %vm1476_vm5, %v8135_v36  ;;  %v1707_v21 = vpop.f32.mrb[37].mxu0  ;;  %v3423_v28 = vrot.slane %v7134_v29, 4  ;;  %v6630_v5 = vld [vmem:[%s8114_s3 + $0xd8] sm:$0xff]  }
 0x28d   : > { %v1708_v57 = vadd.f32 %v1707_v21, %v1583_v53  ;;  %v5904_v20 = vpop.f32.mrb[38].mxu0  ;;  %v3426_v53 = vrot.slane %v7126_v16, 4  ;;  %v8137_v21 = vld [vmem:[#allocation6_spill] sm:$0xff] }
 0x28e   : > { %v5963_v18 = vpop.f32.mrb[16].mxu1  ;;  %v1710_v61 = vpop.f32.mrb[39].mxu0  ;;  %v3424_v56 = vor.u32 %v3423_v28, %v3422_v27 }
 0x28f   : > { %v1711_v8 = vadd.f32 %v1710_v61, %v1586_v37  ;;  %v2245_v59 = vpop.f32.mrb[17].mxu1  ;;  %v3427_v41 = vor.u32 %v3426_v53, %v3425_v58 }
 0x290   : > { %v5964_v2 = vpop.f32.mrb[18].mxu1 }
 0x291   : > { %v2248_v47 = vpop.f32.mrb[19].mxu1  ;;  %v3428_v19 = vsel %vm3421_vm11, %v3424_v56, %v3427_v41  ;;  %v3432_v36 = vsel %vm3421_vm11, %v3427_v41, %v7427_v0  ;;  %v6631_v2 = vld [vmem:[%s8114_s3 + $0xe0] sm:$0xff]  }
 0x293   : > { %6098 = vmatmul.mubr.msk.bf16.gmra.mrb[8].mxu1 %vm1476_vm5, %v8136_v34  ;;  %v7728_v15 = vpop.f32.mrb[20].mxu0 }
 0x294   : > { %6101 = vmatprep.mubr.msk.bf16.mxu1 %vm1476_vm5, %v7432_v51  ;;  %v7736_v37 = vpop.f32.mrb[21].mxu0 }
 0x295   : > { %v7738_v14 = vpop.f32.mrb[22].mxu0 }
 0x296   : > { %v7740_v38 = vpop.f32.mrb[23].mxu0 }
 0x29b   : > { %6102 = vmatmul.mubr.msk.bf16.gmra.mrb[44].mxu1 %vm1476_vm5, %v7435_v6  ;;  %v7744_v9 = vpop.f32.mrb[24].mxu0 }
 0x29c   : > { %6109 = vmatprep.mubr.msk.bf16.mxu1 %vm1476_vm5, %v3428_v19  ;;  %v7748_v62 = vpop.f32.mrb[25].mxu0 }
 0x29d   : > { %v7750_v51 = vpop.f32.mrb[26].mxu0 }
 0x29e   : > { %v7752_v30 = vpop.f32.mrb[27].mxu0 }
 0x2a3   : > { %6110 = vmatmul.mubr.msk.bf16.vlgmr.msra.gmra.mrb[0].mxu1 %vm1476_vm5, %v3432_v36  ;;  %v7760_v6 = vpop.f32.mrb[28].mxu0 }
 0x2a4   : > { %6113 = vmatprep.mubr.msk.bf16.mxu1 %vm1476_vm5, %v8137_v21  ;;  %6126 = vmatpush3.bf16.msra.mxu1 %v6629_v42  ;;  %v7764_v20 = vpop.f32.mrb[29].mxu0 }
 0x2a5   : > { %8138 = vst [vmem:[#allocation2_spill] sm:$0xff] %v7764_v20  ;;  %v7766_v61 = vpop.f32.mrb[30].mxu0  ;;  %6127 = vmatprep.subr.bf16.mxu1 %v6630_v5 }
 0x2a6   : > { %8139 = vst [vmem:[#allocation3_spill] sm:$0xff] %v7766_v61  ;;  %v7771_v34 = vpop.f32.mrb[31].mxu0 }
 0x2a7   : > { %8140 = vst [vmem:[#allocation4_spill] sm:$0xff] %v7771_v34 }
 0x2a8   : > { %6128 = vmatpush3.bf16.msra.mxu1 %v6630_v5 }
 0x2a9   : > { %6145 = vmatprep.subr.bf16.mxu1 %v6631_v2 }
 0x2ab   : > { %6114 = vmatmul.mubr.msk.bf16.gmra.mrb[4].mxu1 %vm1476_vm5, %v7449_v23  ;;  %v5923_v0 = vpop.f32.mrb[40].mxu0 }
 0x2ac   : > { %v1896_v27 = vadd.f32 %v5923_v0, %v1716_v49  ;;  %6117 = vmatprep.mubr.msk.bf16.mxu1 %vm1476_vm5, %v7454_v25  ;;  %v1868_v42 = vpop.f32.mrb[41].mxu0 }
 0x2ad   : > { %v1894_v28 = vadd.f32 %v1868_v42, %v1708_v57  ;;  %v5924_v58 = vpop.f32.mrb[42].mxu0  ;;  %v3607_v57 = vrot.slane %v7117_v54, 4 }
 0x2ae   : > { %v2080_v53 = vadd.f32 %v7695_v50, %v1896_v27  ;;  %v5983_v56 = vpop.f32.mrb[20].mxu1  ;;  %v1871_v41 = vpop.f32.mrb[43].mxu0 }
 0x2af   : > { %v2078_v19 = vadd.f32 %v7698_v60, %v1894_v28  ;;  %v1895_v36 = vadd.f32 %v1871_v41, %v1711_v8  ;;  %v2416_v5 = vpop.f32.mrb[21].mxu1  ;;  %v3606_v60 = vrot.slane %v7119_v55, 4  ;;  %v3609_v8 = vrot.slane %v7156_v52, 4  ;;  %v6633_v52 = vld [vmem:[%s8114_s3 + $0xf0] sm:$0xff]  }
 0x2b0   : > { %v2273_v21 = vadd.f32 %v5963_v18, %v2080_v53  ;;  %v5984_v34 = vpop.f32.mrb[22].mxu1  ;;  %v8141_v18 = vld [vmem:[#allocation7_spill] sm:$0xff]  ;;  %v3619_v28 = vrot.slane %v7242_v46, 4  ;;  %v3774_v41 = vrot.slane %v7137_v33, 4  ;;  %v6634_v33 = vld [vmem:[%s8114_s3 + $0xf8] sm:$0xff]  }
 0x2b1   : > { %v2079_v23 = vadd.f32 %v7701_v1, %v1895_v36  ;;  %v2271_v61 = vadd.f32 %v2245_v59, %v2078_v19  ;;  %v2419_v49 = vpop.f32.mrb[23].mxu1  ;;  %v3608_v1 = vsel %vm3605_vm15, %v3606_v60, %v3607_v57  ;;  %v3610_v55 = vsel %vm3605_vm15, %v3607_v57, %v3609_v8 }
 0x2b2   : > { %v2444_v0 = vadd.f32 %v5983_v56, %v2273_v21  ;;  %v3615_v59 = vrot.slane %v7205_v12, 4  ;;  %v3617_v34 = vrot.slane %v7245_v40, 4  ;;  %v3775_v36 = vrot.slane %v7134_v29, 5 }
 0x2b3   : > { %v2442_v20 = vadd.f32 %v2416_v5, %v2271_v61  ;;  %v2272_v25 = vadd.f32 %v2248_v47, %v2079_v23  ;;  %6118 = vmatmul.mubr.msk.bf16.gmra.mrb[8].mxu1 %vm1476_vm5, %v7462_v39  ;;  %v3611_v39 = vrot.slane %v7153_v45, 4  ;;  %v3613_v45 = vrot.slane %v7208_v32, 4 }
 0x2b4   : > { %6121 = vmatprep.mubr.msk.bf16.mxu1 %vm1476_vm5, %v7468_v24  ;;  %v6632_v24 = vld [vmem:[%s8114_s3 + $0xe8] sm:$0xff]   ;;  %v3618_v56 = vsel %vm3605_vm15, %v3615_v59, %v3617_v34  ;;  %v3620_v19 = vsel %vm3605_vm15, %v3617_v34, %v3619_v28  ;;  %v3777_v40 = vrot.slane %v7129_v17, 4  ;;  %v3778_v5 = vrot.slane %v7126_v16, 5 }
 0x2b5   : > { %v2443_v50 = vadd.f32 %v2419_v49, %v2272_v25  ;;  %v3612_v54 = vsel %vm3605_vm15, %v3609_v8, %v3611_v39  ;;  %v3614_v47 = vsel %vm3605_vm15, %v3611_v39, %v3613_v45  ;;  %v3616_v61 = vsel %vm3605_vm15, %v3613_v45, %v3615_v59 }
 0x2b6   : > { %v3779_v21 = vor.u32 %v3778_v5, %v3777_v40 }
 0x2b8   : > { %v3784_v29 = vsel %vm3773_vm12, %v3779_v21, %v7486_v3 }
 0x2bb   : > { %6122 = vmatmul.mubr.msk.bf16.gmra.mrb[48].mxu1 %vm1476_vm5, %v8141_v18 }
 0x2bc   : > { %6129 = vmatprep.mubr.msk.bf16.mxu1 %vm1476_vm5, %v3608_v1 }
 0x2c3   : > { %6130 = vmatmul.mubr.msk.bf16.vlgmr.msra.gmra.mrb[0].mxu1 %vm1476_vm5, %v3610_v55 }
 0x2c4   : > { %6133 = vmatprep.mubr.msk.bf16.mxu1 %vm1476_vm5, %v3612_v54  ;;  %6146 = vmatpush3.bf16.msra.mxu1 %v6631_v2 }
 0x2c5   : > { %6147 = vmatprep.subr.bf16.mxu1 %v6632_v24 }
 0x2c8   : > { %6148 = vmatpush3.bf16.msra.mxu1 %v6632_v24 }
 0x2c9   : > { %6165 = vmatprep.subr.bf16.mxu1 %v6633_v52 }
 0x2cb   : > { %6134 = vmatmul.mubr.msk.bf16.gmra.mrb[4].mxu1 %vm1476_vm5, %v3614_v47 }
 0x2cc   : > { %6137 = vmatprep.mubr.msk.bf16.mxu1 %vm1476_vm5, %v3616_v61 }
 0x2ce   : > { %v6003_v2 = vpop.f32.mrb[24].mxu1 }
 0x2cf   : > { %v2622_v27 = vadd.f32 %v6003_v2, %v2444_v0  ;;  %v2594_v42 = vpop.f32.mrb[25].mxu1 }
 0x2d0   : > { %v2620_v32 = vadd.f32 %v2594_v42, %v2442_v20  ;;  %v6004_v58 = vpop.f32.mrb[26].mxu1  ;;  %v3776_v20 = vor.u32 %v3775_v36, %v3774_v41 }
 0x2d1   : > { %v2597_v12 = vpop.f32.mrb[27].mxu1 }
 0x2d2   : > { %v2621_v53 = vadd.f32 %v2597_v12, %v2443_v50  ;;  %v3780_v23 = vsel %vm3773_vm12, %v3776_v20, %v3779_v21 }
 0x2d3   : > { %6138 = vmatmul.mubr.msk.bf16.gmra.mrb[8].mxu1 %vm1476_vm5, %v3618_v56 }
 0x2d4   : > { %6141 = vmatprep.mubr.msk.bf16.mxu1 %vm1476_vm5, %v3620_v19 }
 0x2db   : > { %6142 = vmatmul.mubr.msk.bf16.gmra.mrb[52].mxu1 %vm1476_vm5, %v3619_v28 }
 0x2dc   : > { %6149 = vmatprep.mubr.msk.bf16.mxu1 %vm1476_vm5, %v3780_v23 }
 0x2e3   : > { %6150 = vmatmul.mubr.msk.bf16.vlgmr.msra.gmra.mrb[0].mxu1 %vm1476_vm5, %v3784_v29 }
 0x2e4   : > { %6153 = vmatprep.mubr.msk.bf16.mxu1 %vm1476_vm5, %v7501_v48  ;;  %6166 = vmatpush3.bf16.msra.mxu1 %v6633_v52 }
 0x2e5   : > { %6167 = vmatprep.subr.bf16.mxu1 %v6634_v33 }
 0x2e8   : > { %6168 = vmatpush3.bf16.msra.mxu1 %v6634_v33 }
 0x2eb   : > { %6154 = vmatmul.mubr.msk.bf16.gmra.mrb[4].mxu1 %vm1476_vm5, %v7508_v22 }
 0x2ec   : > { %6157 = vmatprep.mubr.msk.bf16.mxu1 %vm1476_vm5, %v7512_v43 }
 0x2ee   : > { %v6023_v16 = vpop.f32.mrb[28].mxu1 }
 0x2ef   : > { %v2752_v17 = vadd.f32 %v6023_v16, %v2622_v27  ;;  %v2724_v49 = vpop.f32.mrb[29].mxu1  ;;  %v6635_v27 = vld [vmem:[%s8118_s7] sm:$0xff]  }
 0x2f0   : > { %v2750_v0 = vadd.f32 %v2724_v49, %v2620_v32  ;;  %v6024_v25 = vpop.f32.mrb[30].mxu1  ;;  %6201 = vmatprep.mubr.msk.bf16.mxu0 %vm4147_vm0, %v6635_v27 }
 0x2f1   : > { %v2727_v3 = vpop.f32.mrb[31].mxu1 }
 0x2f2   : > { %v2751_v50 = vadd.f32 %v2727_v3, %v2621_v53  ;;  %v7869_v3 = vld [vmem:[%s8115_s4] ss:$0 sm:$0xff] }
 0x2f3   : > { %6158 = vmatmul.mubr.msk.bf16.gmra.mrb[8].mxu1 %vm1476_vm5, %v7518_v11 }
 0x2f4   : > { %6161 = vmatprep.mubr.msk.bf16.mxu1 %vm1476_vm5, %v7525_v10 }
 0x2fb   : > { %6162 = vmatmul.mubr.msk.bf16.gmra.mrb[56].mxu1 %vm1476_vm5, %v7514_v44  ;;  %v3957_v44 = vrot.slane %v7242_v46, 5 }
 0x2fc   : > { %6169 = vmatprep.mubr.msk.bf16.mxu1 %vm1476_vm5, %v7604_v35 }
 0x303   : > { %6170 = vmatmul.mubr.msk.bf16.vlgmr.msra.gmra.mrb[0].mxu1 %vm1476_vm5, %v7609_v13  ;;  %v3958_v13 = vsel %vm2758_vm13, %v7630_v63, %v3957_v44 }
 0x304   : > { %6173 = vmatprep.mubr.msk.bf16.mxu1 %vm1476_vm5, %v7619_v31 }
 0x30b   : > { %6174 = vmatmul.mubr.msk.bf16.gmra.mrb[4].mxu1 %vm1476_vm5, %v7624_v26 }
 0x30c   : > { %6177 = vmatprep.mubr.msk.bf16.mxu1 %vm1476_vm5, %v7633_v7 }
 0x30e   : > { %v6043_v48 = vpop.f32.mrb[32].mxu1 }
 0x30f   : > { %v2920_v22 = vadd.f32 %v6043_v48, %v2752_v17  ;;  %v2892_v43 = vpop.f32.mrb[33].mxu1 }
 0x310   : > { %v2918_v11 = vadd.f32 %v2892_v43, %v2750_v0  ;;  %v6044_v10 = vpop.f32.mrb[34].mxu1 }
 0x311   : > { %v2895_v35 = vpop.f32.mrb[35].mxu1 }
 0x312   : > { %v2919_v60 = vadd.f32 %v2895_v35, %v2751_v50 }
 0x313   : > { %6178 = vmatmul.mubr.msk.bf16.gmra.mrb[8].mxu1 %vm1476_vm5, %v7639_v4 }
 0x314   : > { %6181 = vmatprep.mubr.msk.bf16.mxu1 %vm1476_vm5, %v3958_v13 }
 0x31b   : > { %6182 = vmatmul.mubr.msk.bf16.gmra.mrb[60].mxu1 %vm1476_vm5, %v3957_v44 }
 0x32e   : > { %v6063_v31 = vpop.f32.mrb[36].mxu1 }
 0x32f   : > { %v3104_v26 = vadd.f32 %v6063_v31, %v2920_v22  ;;  %v3076_v7 = vpop.f32.mrb[37].mxu1 }
 0x330   : > { %v3102_v57 = vadd.f32 %v3076_v7, %v2918_v11  ;;  %v6064_v18 = vpop.f32.mrb[38].mxu1 }
 0x331   : > { %v3079_v46 = vpop.f32.mrb[39].mxu1 }
 0x332   : > { %v3103_v1 = vadd.f32 %v3079_v46, %v2919_v60 }
 0x34e   : > { %v6083_v8 = vpop.f32.mrb[40].mxu1 }
 0x34f   : > { %v3275_v39 = vadd.f32 %v6083_v8, %v3104_v26  ;;  %v3247_v24 = vpop.f32.mrb[41].mxu1 }
 0x350   : > { %v3273_v55 = vadd.f32 %v3247_v24, %v3102_v57  ;;  %v6084_v54 = vpop.f32.mrb[42].mxu1 }
 0x351   : > { %v3250_v4 = vpop.f32.mrb[43].mxu1 }
 0x352   : > { %v3274_v52 = vadd.f32 %v3250_v4, %v3103_v1 }
 0x36e   : > { %v6103_v45 = vpop.f32.mrb[44].mxu1 }
 0x36f   : > { %v3415_v63 = vadd.f32 %v6103_v45, %v3275_v39  ;;  %v3387_v59 = vpop.f32.mrb[45].mxu1 }
 0x370   : > { %v3413_v47 = vadd.f32 %v3387_v59, %v3273_v55  ;;  %v6104_v61 = vpop.f32.mrb[46].mxu1 }
 0x371   : > { %v3390_v2 = vpop.f32.mrb[47].mxu1 }
 0x372   : > { %v3414_v34 = vadd.f32 %v3390_v2, %v3274_v52 }
 0x38e   : > { %v6123_v42 = vpop.f32.mrb[48].mxu1 }
 0x38f   : > { %v3599_v28 = vadd.f32 %v6123_v42, %v3415_v63  ;;  %v3571_v32 = vpop.f32.mrb[49].mxu1 }
 0x390   : > { %v3597_v58 = vadd.f32 %v3571_v32, %v3413_v47  ;;  %v6124_v12 = vpop.f32.mrb[50].mxu1  ;;  %v8143_v32 = vld [vmem:[#allocation3_spill] sm:$0xff] }
 0x391   : > { %v3574_v53 = vpop.f32.mrb[51].mxu1 }
 0x392   : > { %v3598_v56 = vadd.f32 %v3574_v53, %v3414_v34  ;;  %v8142_v34 = vld [vmem:[#allocation2_spill] sm:$0xff] }
 0x3ae   : > { %v6143_v41 = vpop.f32.mrb[52].mxu1 }
 0x3af   : > { %v3767_v19 = vadd.f32 %v6143_v41, %v3599_v28  ;;  %v3739_v36 = vpop.f32.mrb[53].mxu1 }
 0x3b0   : > { %v3765_v40 = vadd.f32 %v3739_v36, %v3597_v58  ;;  %v6144_v5 = vpop.f32.mrb[54].mxu1 }
 0x3b1   : > { %v3742_v20 = vpop.f32.mrb[55].mxu1 }
 0x3b2   : > { %v3766_v21 = vadd.f32 %v3742_v20, %v3598_v56  ;;  %v8144_v56 = vld [vmem:[#allocation4_spill] sm:$0xff] }
 0x3ce   : > { %v6163_v23 = vpop.f32.mrb[56].mxu1 }
 0x3cf   : > { %v7860_v33 = vadd.f32 %v6163_v23, %v3767_v19  ;;  %v3923_v29 = vpop.f32.mrb[57].mxu1 }
 0x3d0   : > { %v7862_v16 = vadd.f32 %v3923_v29, %v3765_v40  ;;  %v6164_v17 = vpop.f32.mrb[58].mxu1 }
 0x3d1   : > { %v3926_v49 = vpop.f32.mrb[59].mxu1 }
 0x3d2   : > { %v7864_v0 = vadd.f32 %v3926_v49, %v3766_v21 }
 0x3d6   : > { %v6171_v25 = vpop.f32.mrb[0].mxu1 }
 0x3d7   : > { %v6313_v50 = vadd.f32 %v6171_v25, %v7728_v15  ;;  %v4011_v48 = vpop.f32.mrb[1].mxu1 }
 0x3d8   : > { %v6314_v22 = vadd.f32 %v4011_v48, %v7736_v37  ;;  %v6172_v43 = vpop.f32.mrb[2].mxu1 }
 0x3d9   : > { %v4097_v44 = vadd.f32 %v6313_v50, %v7869_v3  ;;  %v6315_v11 = vadd.f32 %v6172_v43, %v7738_v14  ;;  %v4014_v10 = vpop.f32.mrb[3].mxu1 }
 0x3da   : > { %v4095_v35 = vadd.f32 %v6314_v22, %v7869_v3  ;;  %v6316_v60 = vadd.f32 %v4014_v10, %v7740_v38 }
 0x3db   : > { %v4098_v13 = vadd.f32 %v6315_v11, %v7869_v3  ;;  %v4112_v26 = vmax.f32 %v4097_v44, 0.0 }
 0x3dc   : > { %v4096_v31 = vadd.f32 %v6316_v60, %v7869_v3  ;;  %v4110_v15 = vmax.f32 %v4095_v35, 0.0 }
 0x3dd   : > { %v4113_v7 = vmax.f32 %v4098_v13, 0.0 }
 0x3de   : > { %v4111_v57 = vmax.f32 %v4096_v31, 0.0  ;;  %v6175_v18 = vpop.f32.mrb[4].mxu1 }
 0x3df   : > { %v6317_v37 = vadd.f32 %v6175_v18, %v7744_v9  ;;  %v4027_v46 = vpop.f32.mrb[5].mxu1  ;;  %v4126_v1 = vpack.c.bf16 %v4113_v7, %v4112_v26  ;;  %v6639_v18 = vld [vmem:[%s8116_s5 + $0x30] sm:$0xff]  }
 0x3e0   : > { %v6318_v14 = vadd.f32 %v4027_v46, %v7748_v62  ;;  %v6176_v8 = vpop.f32.mrb[6].mxu1  ;;  %v4125_v39 = vpack.c.bf16 %v4111_v57, %v4110_v15  ;;  %v6682_v15 = vmov 0.0   ;;  %v6638_v57 = vld [vmem:[%s8116_s5 + $0x28] sm:$0xff]  }
 0x3e1   : > { %v4101_v24 = vadd.f32 %v6317_v37, %v7869_v3  ;;  %v6319_v38 = vadd.f32 %v6176_v8, %v7750_v51  ;;  %v4030_v55 = vpop.f32.mrb[7].mxu1  ;;  %v6640_v37 = vld [vmem:[%s8116_s5 + $0x38] sm:$0xff]  }
 0x3e2   : > { %v4099_v54 = vadd.f32 %v6318_v14, %v7869_v3  ;;  %v6320_v4 = vadd.f32 %v4030_v55, %v7752_v30  ;;  %6185 = vmatprep.subr.bf16.mxu0 %v4125_v39 }
 0x3e3   : > { %v4102_v52 = vadd.f32 %v6319_v38, %v7869_v3  ;;  %6186 = vmatpush3.bf16.msra.mxu0 %v4125_v39  ;;  %v4116_v45 = vmax.f32 %v4101_v24, 0.0 }
 0x3e4   : > { %v4100_v9 = vadd.f32 %v6320_v4, %v7869_v3  ;;  %6187 = vmatprep.subr.bf16.mxu0 %v4126_v1  ;;  %v4114_v63 = vmax.f32 %v4099_v54, 0.0 }
 0x3e5   : > { %v4117_v62 = vmax.f32 %v4102_v52, 0.0 }
 0x3e6   : > { %v4115_v59 = vmax.f32 %v4100_v9, 0.0  ;;  %v6179_v47 = vpop.f32.mrb[8].mxu1 }
 0x3e7   : > { %v6321_v61 = vadd.f32 %v6179_v47, %v7760_v6  ;;  %v4043_v51 = vpop.f32.mrb[9].mxu1  ;;  %6188 = vmatpush3.bf16.msra.mxu0 %v4126_v1  ;;  %v4128_v2 = vpack.c.bf16 %v4117_v62, %v4116_v45 }
 0x3e8   : > { %v6322_v27 = vadd.f32 %v4043_v51, %v8142_v34  ;;  %v6180_v30 = vpop.f32.mrb[10].mxu1  ;;  %v4127_v42 = vpack.c.bf16 %v4115_v59, %v4114_v63 }
 0x3e9   : > { %v4105_v28 = vadd.f32 %v6321_v61, %v7869_v3  ;;  %v6323_v58 = vadd.f32 %v6180_v30, %v8143_v32  ;;  %v4046_v12 = vpop.f32.mrb[11].mxu1  ;;  %v6641_v30 = vld [vmem:[%s8116_s5] sm:$0xff]  }
 0x3ea   : > { %v4103_v53 = vadd.f32 %v6322_v27, %v7869_v3  ;;  %v6324_v41 = vadd.f32 %v4046_v12, %v8144_v56  ;;  %6189 = vmatprep.subr.bf16.mxu0 %v4127_v42 }
 0x3eb   : > { %v4106_v19 = vadd.f32 %v6323_v58, %v7869_v3  ;;  %6190 = vmatpush3.bf16.msra.mxu0 %v4127_v42  ;;  %v4120_v36 = vmax.f32 %v4105_v28, 0.0 }
 0x3ec   : > { %v4104_v6 = vadd.f32 %v6324_v41, %v7869_v3  ;;  %6191 = vmatprep.subr.bf16.mxu0 %v4128_v2  ;;  %v4118_v5 = vmax.f32 %v4103_v53, 0.0 }
 0x3ed   : > { %v4121_v40 = vmax.f32 %v4106_v19, 0.0 }
 0x3ee   : > { %v4119_v20 = vmax.f32 %v4104_v6, 0.0  ;;  %v6183_v21 = vpop.f32.mrb[60].mxu1 }
 0x3ef   : > { %v4087_v23 = vadd.f32 %v6183_v21, %v7860_v33  ;;  %v4059_v29 = vpop.f32.mrb[61].mxu1  ;;  %6192 = vmatpush3.bf16.msra.mxu0 %v4128_v2  ;;  %v4130_v17 = vpack.c.bf16 %v4121_v40, %v4120_v36  ;;  %v6681_v33 = vmov 65535  }
 0x3f0   : > { %v4085_v49 = vadd.f32 %v4059_v29, %v7862_v16  ;;  %v6184_v25 = vpop.f32.mrb[62].mxu1  ;;  %v4129_v50 = vpack.c.bf16 %v4119_v20, %v4118_v5  ;;  %v4156_v35 = vsel %vm3111_vm14, 4294967295, %v6681_v33  ;;  %v6642_v29 = vld [vmem:[%s8116_s5 + $0x8] sm:$0xff]  }
 0x3f1   : > { %v4109_v48 = vadd.f32 %v7869_v3, %v4087_v23  ;;  %v4062_v22 = vpop.f32.mrb[63].mxu1  ;;  %v4157_v31 = vsel %vm2758_vm13, %v4156_v35, 0  ;;  %v6646_v33 = vld [vmem:[%s8116_s5 + $0x48] sm:$0xff]   ;;  %v6647_v35 = vld [vmem:[%s8116_s5 + $0x50] sm:$0xff]  }
 0x3f2   : > { %v4107_v43 = vadd.f32 %v7869_v3, %v4085_v49  ;;  %v4086_v44 = vadd.f32 %v4062_v22, %v7864_v0  ;;  %6193 = vmatprep.subr.bf16.mxu0 %v4129_v50  ;;  %v6636_v0 = vld [vmem:[%s8118_s7 + $0x8] sm:$0x3f]  }
 0x3f3   : > { %v4124_v11 = vmax.f32 %v4109_v48, 0.0  ;;  %6194 = vmatpush3.bf16.msra.mxu0 %v4129_v50 }
 0x3f4   : > { %v4108_v10 = vadd.f32 %v7869_v3, %v4086_v44  ;;  %6195 = vmatprep.subr.bf16.mxu0 %v4130_v17  ;;  %v4122_v16 = vmax.f32 %v4107_v43, 0.0  ;;  %v6637_v3 = vld [vmem:[%s8116_s5 + $0x20] sm:$0xff]   ;;  %v6643_v44 = vld [vmem:[%s8116_s5 + $0x10] sm:$0xff]  }
 0x3f5   : > { %v4132_v60 = vpack.c.bf16 %v4124_v11, %v4124_v11  ;;  %v6644_v11 = vld [vmem:[%s8116_s5 + $0x18] sm:$0xff]  }
 0x3f6   : > { %v4123_v13 = vmax.f32 %v4108_v10, 0.0  ;;  %v6645_v10 = vld [vmem:[%s8116_s5 + $0x40] sm:$0xff]  }
 0x3f7   : > { %6196 = vmatpush3.bf16.msra.mxu0 %v4130_v17  ;;  %v4159_v7 = vand.u32 %v4157_v31, %v4132_v60  ;;  %v6648_v60 = vld [vmem:[%s8116_s5 + $0x58] sm:$0xff]   ;;  %v6651_v31 = vld [vmem:[%s8116_s5 + $0x70] sm:$0xff]  }
 0x3f8   : > { %v4131_v26 = vpack.c.bf16 %v4123_v13, %v4122_v16  ;;  %v6649_v16 = vld [vmem:[%s8116_s5 + $0x60] sm:$0xff]   ;;  %v6650_v13 = vld [vmem:[%s8116_s5 + $0x68] sm:$0xff]  }
 0x3fa   : > { %6197 = vmatprep.subr.bf16.mxu0 %v4131_v26 }
 0x3fb   : > { %6198 = vmatpush3.bf16.msra.mxu0 %v4131_v26  ;;  %v6652_v26 = vld [vmem:[%s8116_s5 + $0x78] sm:$0xff]  }
 0x3fc   : > { %6199 = vmatprep.subr.bf16.mxu0 %v4159_v7 }
 0x3ff   : > { %6200 = vmatpush3.bf16.msra.mxu0 %v4159_v7  ;;  %v6653_v7 = vld [vmem:[%s8116_s5 + $0x80] sm:$0xff]  }
 0x400   : > { %6205 = vmatprep.subr.bf16.mxu0 %v6682_v15 }
 0x402   : > { %6202 = vmatmul.mubr.msk.bf16.vlgmr.msra.gmra.mrb[44].mxu0 %vm4147_vm0, %v6636_v0  ;;  %v6654_v0 = vld [vmem:[%s8116_s5 + $0x88] sm:$0xff]  }
 0x403   : > { %6206 = vmatpush3.bf16.msra.mxu0 %v6637_v3  ;;  %6213 = vmatprep.mubr.msk.bf16.mxu0 %vm6683_vm4, %v6682_v15  ;;  %v6655_v3 = vld [vmem:[%s8116_s5 + $0x90] sm:$0xff]  }
 0x404   : > { %6207 = vmatprep.subr.bf16.mxu0 %v6682_v15 }
 0x407   : > { %6208 = vmatpush3.bf16.msra.mxu0 %v6638_v57  ;;  %v6656_v57 = vld [vmem:[%s8116_s5 + $0x98] sm:$0xff]  }
 0x408   : > { %6209 = vmatprep.subr.bf16.mxu0 %v6682_v15 }
 0x40b   : > { %6210 = vmatpush3.bf16.msra.mxu0 %v6639_v18  ;;  %v6657_v18 = vld [vmem:[%s8116_s5 + $0xa0] sm:$0xff]  }
 0x40c   : > { %6211 = vmatprep.subr.bf16.mxu0 %v6682_v15 }
 0x40f   : > { %6212 = vmatpush3.bf16.msra.mxu0 %v6640_v37  ;;  %v6658_v37 = vld [vmem:[%s8116_s5 + $0xa8] sm:$0xff]  }
 0x410   : > { %6217 = vmatprep.subr.bf16.mxu0 %v6682_v15 }
 0x4d5   : > { %v6203_v46 = vpop.f32.mrb[44].mxu0 }
 0x4d6   : > { %v4195_v1 = vpop.f32.mrb[45].mxu0 }
 0x4d7   : > { %v6204_v14 = vpop.f32.mrb[46].mxu0 }
 0x4d8   : > { %v4211_v8 = vpack.c.bf16 %v6204_v14, %v6203_v46  ;;  %v4198_v39 = vpop.f32.mrb[47].mxu0  ;;  %v6659_v46 = vld [vmem:[%s8116_s5 + $0xb0] sm:$0xff]   ;;  %v6661_v14 = vld [vmem:[%s8116_s5 + $0xc0] sm:$0xff]  }
 0x4d9   : > { %v4210_v24 = vpack.c.bf16 %v4198_v39, %v4195_v1  ;;  %v6660_v1 = vld [vmem:[%s8116_s5 + $0xb8] sm:$0xff]   ;;  %v6663_v39 = vld [vmem:[%s8116_s5 + $0xd0] sm:$0xff]  }
 0x4da   : > { %v4383_v38 = vrot.slane %v4211_v8, 1  ;;  %v4468_v55 = vshrl.u32 %v4211_v8, 16  ;;  %v4471_v54 = vshll.u32 %v4211_v8, 16  ;;  %v4556_v4 = vrot.slane %v4211_v8, 3 }
 0x4db   : > { %v4230_v52 = vshrl.u32 %v4210_v24, 16  ;;  %v4232_v9 = vshll.u32 %v4210_v24, 16  ;;  %v4382_v45 = vrot.slane %v4210_v24, 1  ;;  %v4555_v62 = vrot.slane %v4210_v24, 3 }
 0x4dc   : > { %v4470_v63 = vrot.slane %v4468_v55, 2  ;;  %v4473_v59 = vrot.slane %v4471_v54, 3  ;;  %v4640_v47 = vrot.slane %v4468_v55, 3  ;;  %v4641_v61 = vrot.slane %v4471_v54, 4 }
 0x4dd   : > { %v4234_v51 = vrot.slane %v4232_v9, 1  ;;  %v4384_v2 = vsel %vm1734_vm9, %v4382_v45, %v4383_v38  ;;  %v4464_v34 = vrot.slane %v4230_v52, 2  ;;  %v4465_v27 = vrot.slane %v4232_v9, 3  ;;  %v6665_v38 = vld [vmem:[%s8116_s5 + $0xe0] sm:$0xff]   ;;  %v6671_v45 = vld [vmem:[%s8116_s5 + $0x110] sm:$0xff]  }
 0x4de   : > { %v4474_v42 = vor.u32 %v4473_v59, %v4470_v63  ;;  %v7931_v28 = vsel %vm1126_vm3, %v4555_v62, %v4556_v4  ;;  %v4637_v32 = vrot.slane %v4230_v52, 3  ;;  %v4638_v58 = vrot.slane %v4232_v9, 4  ;;  %v6668_v4 = vld [vmem:[%s8116_s5 + $0xf8] sm:$0xff]  }
 0x4df   : > { %v4235_v12 = vor.u32 %v4234_v51, %v4230_v52  ;;  %v4466_v53 = vor.u32 %v4465_v27, %v4464_v34  ;;  %v4642_v56 = vor.u32 %v4641_v61, %v4640_v47  ;;  %v4723_v41 = vrot.slane %v4210_v24, 5  ;;  %v6672_v62 = vld [vmem:[%s8116_s5 + $0x118] sm:$0xff]  }
 0x4e0   : > { %v4639_v19 = vor.u32 %v4638_v58, %v4637_v32  ;;  %v4724_v6 = vrot.slane %v4211_v8, 5  ;;  %v4805_v36 = vrot.slane %v4230_v52, 5  ;;  %v4806_v40 = vrot.slane %v4232_v9, 6  ;;  %v6669_v52 = vld [vmem:[%s8116_s5 + $0x100] sm:$0xff]   ;;  %v6670_v9 = vld [vmem:[%s8116_s5 + $0x108] sm:$0xff]  }
 0x4e1   : > { %6214 = vmatmul.mubr.msk.bf16.vlgmr.msra.gmra.mrb[48].mxu0 %vm508_vm1, %v4235_v12  ;;  %v4475_v5 = vsel %vm831_vm2, %v4466_v53, %v4474_v42  ;;  %v4808_v20 = vrot.slane %v4468_v55, 5  ;;  %v4809_v21 = vrot.slane %v4471_v54, 6  ;;  %v4891_v23 = vrot.slane %v4210_v24, 6  ;;  %v6666_v55 = vld [vmem:[%s8116_s5 + $0xe8] sm:$0xff]   ;;  %v6667_v54 = vld [vmem:[%s8116_s5 + $0xf0] sm:$0xff]  }
 0x4e2   : > { %6218 = vmatpush3.bf16.msra.mxu0 %v6641_v30  ;;  %6225 = vmatprep.mubr.msk.bf16.mxu0 %vm6683_vm4, %v6682_v15  ;;  %v7941_v17 = vsel %vm3421_vm11, %v4639_v19, %v4642_v56  ;;  %v7944_v49 = vsel %vm2758_vm13, %v4723_v41, %v4724_v6  ;;  %v4807_v25 = vor.u32 %v4806_v40, %v4805_v36  ;;  %v4892_v50 = vrot.slane %v4211_v8, 6  ;;  %v6662_v8 = vld [vmem:[%s8116_s5 + $0xc8] sm:$0xff]  }
 0x4e3   : > { %6219 = vmatprep.subr.bf16.mxu0 %v6682_v15  ;;  %v4810_v48 = vor.u32 %v4809_v21, %v4808_v20  ;;  %vm4976_vm2 = vcmask 522240  }
 0x4e4   : > { %v7948_v22 = vsel %vm3111_vm14, %v4891_v23, %v4892_v50 }
 0x4e5   : > { %v7951_v43 = vsel %vm2926_vm8, %v4807_v25, %v4810_v48 }
 0x4e6   : > { %6220 = vmatpush3.bf16.msra.mxu0 %v6642_v29 }
 0x4e7   : > { %6221 = vmatprep.subr.bf16.mxu0 %v6682_v15 }
 0x4ea   : > { %6222 = vmatpush3.bf16.msra.mxu0 %v6643_v44 }
 0x4eb   : > { %6223 = vmatprep.subr.bf16.mxu0 %v6682_v15 }
 0x4ee   : > { %6224 = vmatpush3.bf16.msra.mxu0 %v6644_v11 }
 0x4ef   : > { %6229 = vmatprep.subr.bf16.mxu0 %v6682_v15 }
 0x4f1   : > { %6226 = vmatmul.mubr.msk.bf16.vlgmr.msra.gmra.mrb[52].mxu0 %vm508_vm1, %v4210_v24  ;;  %v6664_v24 = vld [vmem:[%s8116_s5 + $0xd8] sm:$0xff]  }
 0x4f2   : > { %6230 = vmatpush3.bf16.msra.mxu0 %v6645_v10  ;;  %6237 = vmatprep.mubr.msk.bf16.mxu0 %vm6683_vm4, %v6682_v15 }
 0x4f3   : > { %6231 = vmatprep.subr.bf16.mxu0 %v6682_v15 }
 0x4f6   : > { %6232 = vmatpush3.bf16.msra.mxu0 %v6646_v33 }
 0x4f7   : > { %6233 = vmatprep.subr.bf16.mxu0 %v6682_v15 }
 0x4fa   : > { %6234 = vmatpush3.bf16.msra.mxu0 %v6647_v35 }
 0x4fb   : > { %6235 = vmatprep.subr.bf16.mxu0 %v6682_v15 }
 0x4fe   : > { %6236 = vmatpush3.bf16.msra.mxu0 %v6648_v60 }
 0x4ff   : > { %6241 = vmatprep.subr.bf16.mxu0 %v6682_v15 }
 0x501   : > { %6238 = vmatmul.mubr.msk.bf16.vlgmr.msra.gmra.mrb[56].mxu0 %vm508_vm1, %v4384_v2 }
 0x502   : > { %6242 = vmatpush3.bf16.msra.mxu0 %v6649_v16  ;;  %6249 = vmatprep.mubr.msk.bf16.mxu0 %vm6683_vm4, %v6682_v15 }
 0x503   : > { %6243 = vmatprep.subr.bf16.mxu0 %v6682_v15 }
 0x506   : > { %6244 = vmatpush3.bf16.msra.mxu0 %v6650_v13 }
 0x507   : > { %6245 = vmatprep.subr.bf16.mxu0 %v6682_v15 }
 0x50a   : > { %6246 = vmatpush3.bf16.msra.mxu0 %v6651_v31 }
 0x50b   : > { %6247 = vmatprep.subr.bf16.mxu0 %v6682_v15 }
 0x50e   : > { %6248 = vmatpush3.bf16.msra.mxu0 %v6652_v26 }
 0x50f   : > { %6253 = vmatprep.subr.bf16.mxu0 %v6682_v15 }
 0x511   : > { %6250 = vmatmul.mubr.msk.bf16.vlgmr.msra.gmra.mrb[60].mxu0 %vm508_vm1, %v4475_v5 }
 0x512   : > { %6254 = vmatpush3.bf16.msra.mxu0 %v6653_v7  ;;  %6261 = vmatprep.mubr.msk.bf16.mxu0 %vm6683_vm4, %v6682_v15 }
 0x513   : > { %6255 = vmatprep.subr.bf16.mxu0 %v6682_v15 }
 0x516   : > { %6256 = vmatpush3.bf16.msra.mxu0 %v6654_v0 }
 0x517   : > { %6257 = vmatprep.subr.bf16.mxu0 %v6682_v15 }
 0x51a   : > { %6258 = vmatpush3.bf16.msra.mxu0 %v6655_v3 }
 0x51b   : > { %6259 = vmatprep.subr.bf16.mxu0 %v6682_v15 }
 0x51e   : > { %6260 = vmatpush3.bf16.msra.mxu0 %v6656_v57  ;;  %v5478_v57 = vld [vmem:[%s8117_s6] ss:$0 sm:$0xff] }
 0x51f   : > { %6265 = vmatprep.subr.bf16.mxu0 %v6682_v15 }
 0x521   : > { %6262 = vmatmul.mubr.msk.bf16.vlgmr.msra.gmra.mrb[64].mxu0 %vm508_vm1, %v7931_v28 }
 0x522   : > { %6266 = vmatpush3.bf16.msra.mxu0 %v6657_v18  ;;  %6273 = vmatprep.mubr.msk.bf16.mxu0 %vm6683_vm4, %v6682_v15 }
 0x523   : > { %6267 = vmatprep.subr.bf16.mxu0 %v6682_v15 }
 0x526   : > { %6268 = vmatpush3.bf16.msra.mxu0 %v6658_v37 }
 0x527   : > { %6269 = vmatprep.subr.bf16.mxu0 %v6682_v15 }
 0x52a   : > { %6270 = vmatpush3.bf16.msra.mxu0 %v6659_v46 }
 0x52b   : > { %6271 = vmatprep.subr.bf16.mxu0 %v6682_v15 }
 0x52e   : > { %6272 = vmatpush3.bf16.msra.mxu0 %v6660_v1 }
 0x52f   : > { %6277 = vmatprep.subr.bf16.mxu0 %v6682_v15 }
 0x531   : > { %6274 = vmatmul.mubr.msk.bf16.vlgmr.msra.gmra.mrb[68].mxu0 %vm508_vm1, %v7941_v17 }
 0x532   : > { %6278 = vmatpush3.bf16.msra.mxu0 %v6661_v14  ;;  %6285 = vmatprep.mubr.msk.bf16.mxu0 %vm6683_vm4, %v6682_v15 }
 0x533   : > { %6279 = vmatprep.subr.bf16.mxu0 %v6682_v15 }
 0x536   : > { %6280 = vmatpush3.bf16.msra.mxu0 %v6662_v8 }
 0x537   : > { %6281 = vmatprep.subr.bf16.mxu0 %v6682_v15 }
 0x53a   : > { %6282 = vmatpush3.bf16.msra.mxu0 %v6663_v39 }
 0x53b   : > { %6283 = vmatprep.subr.bf16.mxu0 %v6682_v15 }
 0x53e   : > { %6284 = vmatpush3.bf16.msra.mxu0 %v6664_v24 }
 0x53f   : > { %6289 = vmatprep.subr.bf16.mxu0 %v6682_v15 }
 0x541   : > { %6286 = vmatmul.mubr.msk.bf16.vlgmr.msra.gmra.mrb[72].mxu0 %vm508_vm1, %v7944_v49 }
 0x542   : > { %6290 = vmatpush3.bf16.msra.mxu0 %v6665_v38  ;;  %6297 = vmatprep.mubr.msk.bf16.mxu0 %vm6683_vm4, %v6682_v15 }
 0x543   : > { %6291 = vmatprep.subr.bf16.mxu0 %v6682_v15 }
 0x546   : > { %6292 = vmatpush3.bf16.msra.mxu0 %v6666_v55 }
 0x547   : > { %6293 = vmatprep.subr.bf16.mxu0 %v6682_v15 }
 0x54a   : > { %6294 = vmatpush3.bf16.msra.mxu0 %v6667_v54 }
 0x54b   : > { %6295 = vmatprep.subr.bf16.mxu0 %v6682_v15 }
 0x54e   : > { %6296 = vmatpush3.bf16.msra.mxu0 %v6668_v4 }
 0x54f   : > { %6301 = vmatprep.subr.bf16.mxu0 %v6682_v15 }
 0x551   : > { %6298 = vmatmul.mubr.msk.bf16.vlgmr.msra.gmra.mrb[76].mxu0 %vm508_vm1, %v7951_v43 }
 0x552   : > { %6302 = vmatpush3.bf16.msra.mxu0 %v6669_v52  ;;  %6309 = vmatprep.mubr.msk.bf16.mxu0 %vm6683_vm4, %v6682_v15 }
 0x553   : > { %6303 = vmatprep.subr.bf16.mxu0 %v6682_v15 }
 0x556   : > { %6304 = vmatpush3.bf16.msra.mxu0 %v6670_v9 }
 0x557   : > { %6305 = vmatprep.subr.bf16.mxu0 %v6682_v15 }
 0x55a   : > { %6306 = vmatpush3.bf16.msra.mxu0 %v6671_v45 }
 0x55b   : > { %6307 = vmatprep.subr.bf16.mxu0 %v6682_v15 }
 0x55e   : > { %6308 = vmatpush3.bf16.msra.mxu0 %v6672_v62 }
 0x561   : > { %6310 = vmatmul.mubr.msk.bf16.vlgmr.msra.gmra.mrb[80].mxu0 %vm508_vm1, %v7948_v22 }
 0x5b4   : > { %v4297_v63 = vpop.f32.mrb[48].mxu0 }
 0x5b5   : > { %v6215_v59 = vpop.f32.mrb[49].mxu0 }
 0x5b6   : > { %v4300_v47 = vpop.f32.mrb[50].mxu0 }
 0x5b7   : > { %v6216_v61 = vpop.f32.mrb[51].mxu0 }
 0x5c4   : > { %v4364_v51 = vpop.f32.mrb[52].mxu0 }
 0x5c5   : > { %v4365_v2 = vadd.f32 %v4364_v51, %v4297_v63  ;;  %v6227_v34 = vpop.f32.mrb[53].mxu0 }
 0x5c6   : > { %v4367_v27 = vpop.f32.mrb[54].mxu0 }
 0x5c7   : > { %v4368_v30 = vadd.f32 %v4367_v27, %v4300_v47  ;;  %v6228_v42 = vpop.f32.mrb[55].mxu0 }
 0x5d4   : > { %v4446_v28 = vpop.f32.mrb[56].mxu0 }
 0x5d5   : > { %v4453_v32 = vadd.f32 %v4446_v28, %v4365_v2  ;;  %v6239_v58 = vpop.f32.mrb[57].mxu0 }
 0x5d6   : > { %v4449_v12 = vpop.f32.mrb[58].mxu0 }
 0x5d7   : > { %v4454_v53 = vadd.f32 %v4449_v12, %v4368_v30  ;;  %v6240_v15 = vpop.f32.mrb[59].mxu0 }
 0x5e4   : > { %v4537_v56 = vpop.f32.mrb[60].mxu0 }
 0x5e5   : > { %v4544_v41 = vadd.f32 %v4537_v56, %v4453_v32  ;;  %v6251_v19 = vpop.f32.mrb[61].mxu0 }
 0x5e6   : > { %v4540_v6 = vpop.f32.mrb[62].mxu0 }
 0x5e7   : > { %v4545_v36 = vadd.f32 %v4540_v6, %v4454_v53  ;;  %v6252_v40 = vpop.f32.mrb[63].mxu0 }
 0x5f4   : > { %v4619_v5 = vpop.f32.mrb[64].mxu0 }
 0x5f5   : > { %v4626_v20 = vadd.f32 %v4619_v5, %v4544_v41  ;;  %v6263_v21 = vpop.f32.mrb[65].mxu0 }
 0x5f6   : > { %v4622_v23 = vpop.f32.mrb[66].mxu0 }
 0x5f7   : > { %v4627_v29 = vadd.f32 %v4622_v23, %v4545_v36  ;;  %v6264_v17 = vpop.f32.mrb[67].mxu0 }
 0x604   : > { %v4705_v49 = vpop.f32.mrb[68].mxu0 }
 0x605   : > { %v4712_v25 = vadd.f32 %v4705_v49, %v4626_v20  ;;  %v6275_v50 = vpop.f32.mrb[69].mxu0 }
 0x606   : > { %v4708_v48 = vpop.f32.mrb[70].mxu0 }
 0x607   : > { %v4713_v22 = vadd.f32 %v4708_v48, %v4627_v29  ;;  %v6276_v43 = vpop.f32.mrb[71].mxu0 }
 0x614   : > { %v4787_v44 = vpop.f32.mrb[72].mxu0 }
 0x615   : > { %v4794_v11 = vadd.f32 %v4787_v44, %v4712_v25  ;;  %v6287_v10 = vpop.f32.mrb[73].mxu0 }
 0x616   : > { %v4790_v33 = vpop.f32.mrb[74].mxu0 }
 0x617   : > { %v4795_v35 = vadd.f32 %v4790_v33, %v4713_v22  ;;  %v6288_v60 = vpop.f32.mrb[75].mxu0 }
 0x624   : > { %v4873_v16 = vpop.f32.mrb[76].mxu0 }
 0x625   : > { %v4880_v13 = vadd.f32 %v4873_v16, %v4794_v11  ;;  %v6299_v31 = vpop.f32.mrb[77].mxu0 }
 0x626   : > { %v4876_v26 = vpop.f32.mrb[78].mxu0 }
 0x627   : > { %v4881_v7 = vadd.f32 %v4876_v26, %v4795_v35  ;;  %v6300_v0 = vpop.f32.mrb[79].mxu0 }
 0x634   : > { %v4955_v3 = vpop.f32.mrb[80].mxu0 }
 0x635   : > { %v4962_v18 = vadd.f32 %v4955_v3, %v4880_v13  ;;  %v6311_v37 = vpop.f32.mrb[81].mxu0 }
 0x636   : > { %v4958_v46 = vpop.f32.mrb[82].mxu0 }
 0x637   : > { %v4971_v1 = vadd.f32 %v5478_v57, %v4962_v18  ;;  %v4963_v14 = vadd.f32 %v4958_v46, %v4881_v7  ;;  %v6312_v8 = vpop.f32.mrb[83].mxu0 }
 0x639   : > { %v4973_v39 = vmax.f32 %v4971_v1, 0.0  ;;  %v4972_v24 = vadd.f32 %v5478_v57, %v4963_v14 }
 0x63b   : > { %4975 = vst.msk [vmem:[%s305_s12] sm:$0xff] %vm508_vm1, %v4973_v39  ;;  %v4974_v38 = vmax.f32 %v4972_v24, 0.0 }
 0x63d   : > { %4977 = vst.msk [vmem:[%s305_s12 + $0x8] sm:$0x7f] %vm4976_vm2, %v4974_v38 }
 0x63e PF: > { %s18_s27 = sadd.s32 1, %s6679_s27  }
 0x63f   : > { %p15_p4 = scmp.ge.s32.totalorder %s18_s27, 4  }
 0x641   :  { %17 = sbr.rel (!%p15_p4) target bundleno = 1 (0x1), region = 108 }

</bundles_post_ra>
